<compile_context>
chip_gen: v7x
topology: tpu7x:2x2x1
jax: 0.10.0
libtpu: 0.0.40
codegen_flags: <defaults>
</compile_context>

<pallas_src>
import jax
import jax.numpy as jnp
import numpy as np
from jax.experimental import pallas as pl
from jax.experimental.pallas import tpu as pltpu

# These mirror the argparse globals of the original script (static at trace time).
DATATYPE = "hypergraph"     # anything != 'clique' enables the tuplewise loss term
NUM_NEGATIVES = 2
TUPLE_OPTION = "average"    # or "min"

_MAX_BLOCK_NODES = 512      # nodes per grid step (sublane axis); multiple of 8


def _softplus(x):
    # Exact formulation used by torch.nn.functional.binary_cross_entropy_with_logits:
    #   max(x,0) - x*y + log(1+exp(-|x|)),  y in {0,1}
    # y=1 -> softplus(-x), y=0 -> softplus(x)
    return jnp.maximum(x, 0.0) + jnp.log1p(jnp.exp(-jnp.abs(x)))


def _round_up(x, m):
    return ((x + m - 1) // m) * m


def _make_kernel(num_nodes, block_nodes):
    def kernel(src_ref, pos_ref, neg_ref, pair_ref, tup_ref):
        i = pl.program_id(0)

        src = src_ref[...].astype(jnp.float32)        # (B, D)   source node rows
        pos = pos_ref[...].astype(jnp.float32)        # (B, P, D) positive neighbors
        neg = neg_ref[...].astype(jnp.float32)        # (B, G, K, D) negatives (tuples contiguous)

        # dot(source, neighbor) then sigmoid — the torch code feeds these *sigmoid*
        # scores into BCE-with-logits (double sigmoid), reproduced faithfully here.
        pos_logit = jnp.sum(pos * src[:, None, :], axis=-1)          # (B, P)
        neg_logit = jnp.sum(neg * src[:, None, None, :], axis=-1)    # (B, G, K)
        pos_s = jax.nn.sigmoid(pos_logit)
        neg_s = jax.nn.sigmoid(neg_logit)

        # Valid-row mask for the zero-padded tail of the last block.
        row = i * block_nodes + jax.lax.broadcasted_iota(
            jnp.int32, (block_nodes, 1), 0)
        valid = row < num_nodes                                       # (B, 1)

        # Pairwise BCE-with-logits terms (raw softplus sums; the constant per-node
        # and global denominators are folded into the wrapper epilogue).
        pair_node = (jnp.sum(_softplus(-pos_s), axis=-1, keepdims=True)
                     + jnp.sum(jnp.sum(_softplus(neg_s), axis=-1),
                               axis=-1, keepdims=True))               # (B, 1)
        pair_ref[...] = jnp.where(valid, pair_node, 0.0)

        if DATATYPE == "clique":
            tup_ref[...] = jnp.zeros_like(tup_ref)
            return

        # Tuplewise term: negatives already grouped as (G, K), reduced per tuple,
        # then BCE-with-logits on the reduced sigmoid scores.
        if TUPLE_OPTION == "average":
            neg_t = jnp.mean(neg_s, axis=-1)                          # (B, G)
            pos_t = jnp.mean(pos_s, axis=-1, keepdims=True)           # (B, 1)
        else:  # "min"
            neg_t = jnp.min(neg_s, axis=-1)
            pos_t = jnp.min(pos_s, axis=-1, keepdims=True)
        tup_node = (_softplus(-pos_t)
                    + jnp.sum(_softplus(neg_t), axis=-1, keepdims=True))  # (B, 1)
        tup_ref[...] = jnp.where(valid, tup_node, 0.0)

    return kernel


def cross_entropy_loss(node_features, pos_idx, neg_idx, hyperedge_node_idx):
    num_nodes, D = node_features.shape
    P = pos_idx.shape[1]
    N = neg_idx.shape[1]
    assert N % NUM_NEGATIVES == 0
    K = N // NUM_NEGATIVES
    G = NUM_NEGATIVES

    # Nodes per grid step: multiple of 8 (sublane rule), capped for VMEM.
    B = min(_MAX_BLOCK_NODES, _round_up(num_nodes, 8))
    num_blocks = pl.cdiv(num_nodes, B)
    Np = num_blocks * B
    pad = Np - num_nodes

    # Glue: fixed-degree neighbor gather (same as node_features[sparse._indices()]).
    # TODO(synk): for large graphs, gather neighbor rows in-kernel instead
    # (memory_space=pl.ANY + PrefetchScalarGridSpec(num_scalar_prefetch=2) +
    # make_async_copy per row) to avoid writing (P+N) copies of the table to HBM.
    pos_feats = node_features[pos_idx]                                   # (num_nodes, P, D)
    neg_feats = node_features[neg_idx].reshape(num_nodes, G, K, D)

    src_p = jnp.pad(node_features, ((0, pad), (0, 0)))
    pos_p = jnp.pad(pos_feats, ((0, pad), (0, 0), (0, 0)))
    neg_p = jnp.pad(neg_feats, ((0, pad), (0, 0), (0, 0), (0, 0)))

    cost = pl.CostEstimate(
        flops=2 * num_nodes * (P + N) * D,
        transcendentals=3 * num_nodes * (P + N),
        bytes_accessed=4 * (Np * D * (1 + P + N) + 2 * Np),
    )

    pair_out, tup_out = pl.pallas_call(
        _make_kernel(num_nodes, B),
        out_shape=(
            jax.ShapeDtypeStruct((Np, 1), jnp.float32),   # per-node pairwise partials
            jax.ShapeDtypeStruct((Np, 1), jnp.float32),   # per-node tuplewise partials
        ),
        grid_spec=pltpu.PrefetchScalarGridSpec(
            num_scalar_prefetch=0,
            grid=(num_blocks,),
            in_specs=[
                pl.BlockSpec((B, D), lambda i: (i, 0)),
                pl.BlockSpec((B, P, D), lambda i: (i, 0, 0)),
                pl.BlockSpec((B, G, K, D), lambda i: (i, 0, 0, 0)),
            ],
            out_specs=[
                pl.BlockSpec((B, 1), lambda i: (i, 0)),
                pl.BlockSpec((B, 1), lambda i: (i, 0)),
            ],
        ),
        compiler_params=pltpu.CompilerParams(
            dimension_semantics=("parallel",),
            vmem_limit_bytes=32 * 1024 * 1024,
        ),
        cost_estimate=cost,
    )(src_p, pos_p, neg_p)

    # Epilogue: all constant denominators folded into one multiply per term.
    pairwise_loss = jnp.sum(pair_out) / (num_nodes * (P + N))
    if DATATYPE == "clique":
        return pairwise_loss
    tuplewise_loss = jnp.sum(tup_out) / (
        (num_nodes - hyperedge_node_idx) * (1 + NUM_NEGATIVES))
    return pairwise_loss + tuplewise_loss


def _reference(node_features, pos_idx, neg_idx, hyperedge_node_idx):
    # Pure-JAX re-implementation of the torch forward (per-node python loop).
    num_nodes = node_features.shape[0]
    pair = 0.0
    tup = 0.0
    for n in range(num_nodes):
        src = node_features[n]
        pos_s = jax.nn.sigmoid(node_features[pos_idx[n]] @ src)
        neg_s = jax.nn.sigmoid(node_features[neg_idx[n]] @ src)
        pair += (jnp.sum(_softplus(-pos_s)) + jnp.sum(_softplus(neg_s))) / (
            pos_s.size + neg_s.size)
        if DATATYPE == "clique":
            continue
        neg_t = neg_s.reshape(NUM_NEGATIVES, -1)
        if TUPLE_OPTION == "average":
            neg_t = jnp.mean(neg_t, axis=1)
            pos_t = jnp.mean(pos_s)
        else:
            neg_t = jnp.min(neg_t, axis=1)
            pos_t = jnp.min(pos_s)
        tup += (_softplus(-pos_t) + jnp.sum(_softplus(neg_t))) / (1 + NUM_NEGATIVES)
    pair = pair / num_nodes
    if DATATYPE == "clique":
        return pair
    return pair + tup / (num_nodes - hyperedge_node_idx)


if __name__ == "__main__":
    key = jax.random.PRNGKey(0)
    num_nodes, D = 16, 32
    P = 4                       # positives per node (fixed-degree adjacency)
    K = 3                       # negatives per tuple
    N = NUM_NEGATIVES * K       # negatives per node
    hyperedge_node_idx = 4

    k1, k2, k3 = jax.random.split(key, 3)
    node_features = jax.random.normal(k1, (num_nodes, D), dtype=jnp.float32)
    pos_idx = jax.random.randint(k2, (num_nodes, P), 0, num_nodes, dtype=jnp.int32)
    neg_idx = jax.random.randint(k3, (num_nodes, N), 0, num_nodes, dtype=jnp.int32)

    out = cross_entropy_loss(node_features, pos_idx, neg_idx, hyperedge_node_idx)
    out = jax.block_until_ready(out)

    ref = _reference(node_features, pos_idx, neg_idx, hyperedge_node_idx)
    np.testing.assert_allclose(np.asarray(out), np.asarray(ref), rtol=1e-5, atol=1e-5)
    print("KERNEL_OK")
</pallas_src>

<mosaic_0001>
module attributes {stable_mosaic.version = 11 : i64} {
  func.func @kernel(%arg0: i32, %arg1: memref<16x32xf32, #tpu.memory_space<vmem>>, %arg2: memref<16x4x32xf32, #tpu.memory_space<vmem>>, %arg3: memref<16x2x3x32xf32, #tpu.memory_space<vmem>>, %arg4: memref<16x1xf32, #tpu.memory_space<vmem>>, %arg5: memref<16x1xf32, #tpu.memory_space<vmem>>) attributes {dimension_semantics = [#tpu.dimension_semantics<parallel>], iteration_bounds = array<i64: 1>, scalar_prefetch = 0 : i64, scratch_operands = 0 : i64, tpu.core_type = #tpu.core_type<tc>, window_params = [{transform_indices = @transform_0, window_bounds = array<i64: 16, 32>}, {transform_indices = @transform_1, window_bounds = array<i64: 16, 4, 32>}, {transform_indices = @transform_2, window_bounds = array<i64: 16, 2, 3, 32>}, {transform_indices = @transform_3, window_bounds = array<i64: 16, 1>}, {transform_indices = @transform_4, window_bounds = array<i64: 16, 1>}]} {
    %c0 = arith.constant 0 : index
    %c0_0 = arith.constant 0 : index
    %0 = vector.load %arg1[%c0, %c0_0] : memref<16x32xf32, #tpu.memory_space<vmem>>, vector<16x32xf32>
    %c0_1 = arith.constant 0 : index
    %c0_2 = arith.constant 0 : index
    %c0_3 = arith.constant 0 : index
    %1 = vector.load %arg2[%c0_1, %c0_2, %c0_3] : memref<16x4x32xf32, #tpu.memory_space<vmem>>, vector<16x4x32xf32>
    %c0_4 = arith.constant 0 : index
    %c0_5 = arith.constant 0 : index
    %c0_6 = arith.constant 0 : index
    %c0_7 = arith.constant 0 : index
    %2 = vector.load %arg3[%c0_4, %c0_5, %c0_6, %c0_7] : memref<16x2x3x32xf32, #tpu.memory_space<vmem>>, vector<16x2x3x32xf32>
    %3 = vector.shape_cast %0 : vector<16x32xf32> to vector<16x1x32xf32>
    %4 = vector.broadcast %3 : vector<16x1x32xf32> to vector<16x4x32xf32>
    %5 = arith.mulf %1, %4 : vector<16x4x32xf32>
    %cst = arith.constant dense<0.000000e+00> : vector<16x4xf32>
    %6 = vector.multi_reduction <add>, %5, %cst [2] : vector<16x4x32xf32> to vector<16x4xf32>
    %7 = vector.shape_cast %0 : vector<16x32xf32> to vector<16x1x1x32xf32>
    %8 = vector.broadcast %7 : vector<16x1x1x32xf32> to vector<16x2x3x32xf32>
    %9 = arith.mulf %2, %8 : vector<16x2x3x32xf32>
    %cst_8 = arith.constant dense<0.000000e+00> : vector<16x2x3xf32>
    %10 = vector.multi_reduction <add>, %9, %cst_8 [3] : vector<16x2x3x32xf32> to vector<16x2x3xf32>
    %11 = arith.negf %6 : vector<16x4xf32>
    %12 = math.exp %11 : vector<16x4xf32>
    %cst_9 = arith.constant 1.000000e+00 : f32
    %13 = vector.broadcast %cst_9 : f32 to vector<16x4xf32>
    %14 = arith.addf %13, %12 : vector<16x4xf32>
    %15 = arith.divf %13, %14 : vector<16x4xf32>
    %16 = arith.negf %10 : vector<16x2x3xf32>
    %17 = math.exp %16 : vector<16x2x3xf32>
    %cst_10 = arith.constant 1.000000e+00 : f32
    %18 = vector.broadcast %cst_10 : f32 to vector<16x2x3xf32>
    %19 = arith.addf %18, %17 : vector<16x2x3xf32>
    %20 = arith.divf %18, %19 : vector<16x2x3xf32>
    %c16_i32 = arith.constant 16 : i32
    %21 = arith.muli %arg0, %c16_i32 : i32
    %22 = tpu.iota {dimensions = array<i32: 0>} : vector<16x1xi32>
    %23 = vector.broadcast %21 : i32 to vector<16x1xi32>
    %24 = arith.addi %23, %22 : vector<16x1xi32>
    %c16_i32_11 = arith.constant 16 : i32
    %25 = vector.broadcast %c16_i32_11 : i32 to vector<16x1xi32>
    %26 = arith.cmpi slt, %24, %25 : vector<16x1xi32>
    %cst_12 = arith.constant 0.000000e+00 : f32
    %27 = vector.broadcast %cst_12 : f32 to vector<16x4xf32>
    %28 = arith.subf %27, %15 : vector<16x4xf32>
    %cst_13 = arith.constant 0.000000e+00 : f32
    %29 = vector.broadcast %cst_13 : f32 to vector<16x4xf32>
    %30 = arith.maximumf %28, %29 : vector<16x4xf32>
    %31 = math.absf %28 : vector<16x4xf32>
    %cst_14 = arith.constant 0.000000e+00 : f32
    %32 = vector.broadcast %cst_14 : f32 to vector<16x4xf32>
    %33 = arith.subf %32, %31 : vector<16x4xf32>
    %34 = math.exp %33 : vector<16x4xf32>
    %35 = math.log1p %34 : vector<16x4xf32>
    %36 = arith.addf %30, %35 : vector<16x4xf32>
    %cst_15 = arith.constant dense<0.000000e+00> : vector<16xf32>
    %37 = vector.multi_reduction <add>, %36, %cst_15 [1] : vector<16x4xf32> to vector<16xf32>
    %38 = vector.shape_cast %37 : vector<16xf32> to vector<16x1xf32>
    %cst_16 = arith.constant 0.000000e+00 : f32
    %39 = vector.broadcast %cst_16 : f32 to vector<16x2x3xf32>
    %40 = arith.maximumf %20, %39 : vector<16x2x3xf32>
    %41 = math.absf %20 : vector<16x2x3xf32>
    %cst_17 = arith.constant 0.000000e+00 : f32
    %42 = vector.broadcast %cst_17 : f32 to vector<16x2x3xf32>
    %43 = arith.subf %42, %41 : vector<16x2x3xf32>
    %44 = math.exp %43 : vector<16x2x3xf32>
    %45 = math.log1p %44 : vector<16x2x3xf32>
    %46 = arith.addf %40, %45 : vector<16x2x3xf32>
    %cst_18 = arith.constant dense<0.000000e+00> : vector<16x2xf32>
    %47 = vector.multi_reduction <add>, %46, %cst_18 [2] : vector<16x2x3xf32> to vector<16x2xf32>
    %cst_19 = arith.constant dense<0.000000e+00> : vector<16xf32>
    %48 = vector.multi_reduction <add>, %47, %cst_19 [1] : vector<16x2xf32> to vector<16xf32>
    %49 = vector.shape_cast %48 : vector<16xf32> to vector<16x1xf32>
    %50 = arith.addf %38, %49 : vector<16x1xf32>
    %cst_20 = arith.constant 0.000000e+00 : f32
    %51 = vector.broadcast %cst_20 : f32 to vector<16x1xf32>
    %52 = arith.select %26, %50, %51 : vector<16x1xi1>, vector<16x1xf32>
    %c0_21 = arith.constant 0 : index
    %c0_22 = arith.constant 0 : index
    %53 = vector.load %arg4[%c0_21, %c0_22] : memref<16x1xf32, #tpu.memory_space<vmem>>, vector<16x1xf32>
    tpu.vector_store %arg4[%c0_21, %c0_22], %52 {strides = array<i32>} : memref<16x1xf32, #tpu.memory_space<vmem>>, vector<16x1xf32>,
    %cst_23 = arith.constant dense<0.000000e+00> : vector<16x2xf32>
    %54 = vector.multi_reduction <add>, %20, %cst_23 [2] : vector<16x2x3xf32> to vector<16x2xf32>
    %cst_24 = arith.constant 3.000000e+00 : f32
    %55 = vector.broadcast %cst_24 : f32 to vector<16x2xf32>
    %56 = arith.divf %54, %55 : vector<16x2xf32>
    %cst_25 = arith.constant dense<0.000000e+00> : vector<16xf32>
    %57 = vector.multi_reduction <add>, %15, %cst_25 [1] : vector<16x4xf32> to vector<16xf32>
    %58 = vector.shape_cast %57 : vector<16xf32> to vector<16x1xf32>
    %cst_26 = arith.constant 4.000000e+00 : f32
    %59 = vector.broadcast %cst_26 : f32 to vector<16x1xf32>
    %60 = arith.divf %58, %59 : vector<16x1xf32>
    %cst_27 = arith.constant 0.000000e+00 : f32
    %61 = vector.broadcast %cst_27 : f32 to vector<16x1xf32>
    %62 = arith.subf %61, %60 : vector<16x1xf32>
    %cst_28 = arith.constant 0.000000e+00 : f32
    %63 = vector.broadcast %cst_28 : f32 to vector<16x1xf32>
    %64 = arith.maximumf %62, %63 : vector<16x1xf32>
    %65 = math.absf %62 : vector<16x1xf32>
    %cst_29 = arith.constant 0.000000e+00 : f32
    %66 = vector.broadcast %cst_29 : f32 to vector<16x1xf32>
    %67 = arith.subf %66, %65 : vector<16x1xf32>
    %68 = math.exp %67 : vector<16x1xf32>
    %69 = math.log1p %68 : vector<16x1xf32>
    %70 = arith.addf %64, %69 : vector<16x1xf32>
    %cst_30 = arith.constant 0.000000e+00 : f32
    %71 = vector.broadcast %cst_30 : f32 to vector<16x2xf32>
    %72 = arith.maximumf %56, %71 : vector<16x2xf32>
    %73 = math.absf %56 : vector<16x2xf32>
    %cst_31 = arith.constant 0.000000e+00 : f32
    %74 = vector.broadcast %cst_31 : f32 to vector<16x2xf32>
    %75 = arith.subf %74, %73 : vector<16x2xf32>
    %76 = math.exp %75 : vector<16x2xf32>
    %77 = math.log1p %76 : vector<16x2xf32>
    %78 = arith.addf %72, %77 : vector<16x2xf32>
    %cst_32 = arith.constant dense<0.000000e+00> : vector<16xf32>
    %79 = vector.multi_reduction <add>, %78, %cst_32 [1] : vector<16x2xf32> to vector<16xf32>
    %80 = vector.shape_cast %79 : vector<16xf32> to vector<16x1xf32>
    %81 = arith.addf %70, %80 : vector<16x1xf32>
    %cst_33 = arith.constant 0.000000e+00 : f32
    %82 = vector.broadcast %cst_33 : f32 to vector<16x1xf32>
    %83 = arith.select %26, %81, %82 : vector<16x1xi1>, vector<16x1xf32>
    %c0_34 = arith.constant 0 : index
    %c0_35 = arith.constant 0 : index
    %84 = vector.load %arg5[%c0_34, %c0_35] : memref<16x1xf32, #tpu.memory_space<vmem>>, vector<16x1xf32>
    tpu.vector_store %arg5[%c0_34, %c0_35], %83 {strides = array<i32>} : memref<16x1xf32, #tpu.memory_space<vmem>>, vector<16x1xf32>,
    return
  }
  func.func @transform_0(%arg0: i32) -> (i32, i32) {
    %c0_i32 = arith.constant 0 : i32
    %c0_i32_0 = arith.constant 0 : i32
    return %arg0, %c0_i32 : i32, i32
  }
  func.func @transform_1(%arg0: i32) -> (i32, i32, i32) {
    %c0_i32 = arith.constant 0 : i32
    %c0_i32_0 = arith.constant 0 : i32
    %c0_i32_1 = arith.constant 0 : i32
    return %arg0, %c0_i32, %c0_i32_0 : i32, i32, i32
  }
  func.func @transform_2(%arg0: i32) -> (i32, i32, i32, i32) {
    %c0_i32 = arith.constant 0 : i32
    %c0_i32_0 = arith.constant 0 : i32
    %c0_i32_1 = arith.constant 0 : i32
    %c0_i32_2 = arith.constant 0 : i32
    return %arg0, %c0_i32, %c0_i32_0, %c0_i32_1 : i32, i32, i32, i32
  }
  func.func @transform_3(%arg0: i32) -> (i32, i32) {
    %c0_i32 = arith.constant 0 : i32
    %c0_i32_0 = arith.constant 0 : i32
    return %arg0, %c0_i32 : i32, i32
  }
  func.func @transform_4(%arg0: i32) -> (i32, i32) {
    %c0_i32 = arith.constant 0 : i32
    %c0_i32_0 = arith.constant 0 : i32
    return %arg0, %c0_i32 : i32, i32
  }
}

</mosaic_0001>

<bundles_post_ra>
// kernel: tpu_custom_call.1
= control target key start
LH: loop header
LB: loop body
LE: loop exit
PB: predicated region body
PF: predicated region fallthrough
CT: control target
= control target key end

     0   :  { %v72_v0 = vlaneseq  ;;  %v3193_v1 = vmov 1966171168   ;;  %vm343_vm0 = vcmask 256000   ;;  %vm262_vm1 = vcmask 257024   ;;  %s5250_s0 = inlined_call_operand.vmem [shape: f32[16,32], index: 0, kind: input, shape index: {}]   ;;  %s5251_s2 = inlined_call_operand.vmem [shape: f32[16,2,3,32], index: 2, kind: input, shape index: {}]   ;;  %s5252_s1 = inlined_call_operand.vmem [shape: f32[16,4,32], index: 1, kind: input, shape index: {}]   ;;  %s5253_s3 = inlined_call_operand.vmem [shape: f32[16,1], index: 3, kind: output, shape index: {0}]   ;;  %s5254_s4 = inlined_call_operand.vmem [shape: f32[16,1], index: 4, kind: output, shape index: {1}]  }
   0x1   :  { %v70_v2 = vunpack.c.l.s4 %v3193_v1  ;;  %v3222_v6 = vld [vmem:[%s5250_s0 + $0x8] sm:$0xff]  ;;  %v3229_v8 = vld [vmem:[%s5250_s0] sm:$0xff]  ;;  %v38_v48 = vld [vmem:[%s5251_s2 + $0x10] sm:$0x7]  ;;  %vm1075_vm2 = vcmask 1041409   ;;  %vm1777_vm3 = vcmask 17408  }
   0x2   :  { %v73_v3 = vshrl.u32 %v72_v0, 7  ;;  %v1010_v4 = vand.u32 127, %v72_v0  ;;  %v51_v17 = vld [vmem:[%s5251_s2 + $0x44] sm:$0x7]  ;;  %v34_v18 = vld [vmem:[%s5251_s2] sm:$0x7]  ;;  %v68_v50 = vcombine.high %v3229_v8, %v3229_v8  ;;  %v117_v59 = vcombine.high %v3222_v6, %v3222_v6 }
   0x3   :  { %v71_v5 = vunpack.c.0.s8 %v70_v2  ;;  %v35_v19 = vld [vmem:[%s5251_s2 + $0x4] sm:$0x7]  ;;  %v36_v23 = vld [vmem:[%s5251_s2 + $0x8] sm:$0x7]  ;;  %v50_v29 = vld [vmem:[%s5251_s2 + $0x40] sm:$0x7] }
   0x4   :  { %v3224_v7 = vsub.s32 %v1010_v4, %v73_v3  ;;  %v3235_v11 = vsub.s32 0, %v73_v3  ;;  %v37_v30 = vld [vmem:[%s5251_s2 + $0xc] sm:$0x7]  ;;  %v52_v40 = vld [vmem:[%s5251_s2 + $0x48] sm:$0x7] }
   0x5   :  { %v3231_v9 = vsub.s32 %v71_v5, %v73_v3  ;;  %v53_v41 = vld [vmem:[%s5251_s2 + $0x4c] sm:$0x7]  ;;  %v39_v49 = vld [vmem:[%s5251_s2 + $0x14] sm:$0x7]  ;;  %v54_v56 = vld [vmem:[%s5251_s2 + $0x50] sm:$0x7] }
   0x6   :  { %v55_v57 = vld [vmem:[%s5251_s2 + $0x54] sm:$0x7]  ;;  %v41_v3 = vld [vmem:[%s5251_s2 + $0x1c] sm:$0x7]  ;;  %v40_v4 = vld [vmem:[%s5251_s2 + $0x18] sm:$0x7] }
   0x7   :  { %v124_v10 = vrot.slane %v3222_v6, %v3231_v9  ;;  %v75_v12 = vrot.slane %v3229_v8, %v3231_v9  ;;  %v82_v62 = vrot.slane %v68_v50, %v3231_v9  ;;  %v131_v8 = vrot.slane %v117_v59, %v3231_v9 }
   0x9   :  { %v140_v13 = vrot.slane %v124_v10, %v3231_v9  ;;  %v91_v14 = vrot.slane %v75_v12, %v3231_v9  ;;  %v83_v15 = vcombine.high %v75_v12, %v75_v12  ;;  %v132_v16 = vcombine.high %v124_v10, %v124_v10 }
   0xa   :  { %v98_v6 = vrot.slane %v82_v62, %v3231_v9 }
   0xb   :  { %v3251_v20 = vrot.slane %v140_v13, %v3235_v11  ;;  %v3254_v21 = vrot.slane %v91_v14, %v3235_v11  ;;  %v105_v22 = vrot.slane %v83_v15, %v3231_v9  ;;  %v154_v24 = vrot.slane %v132_v16, %v3231_v9  ;;  %v57_v15 = vld [vmem:[%s5251_s2 + $0x5c] sm:$0x7]  ;;  %v56_v16 = vld [vmem:[%s5251_s2 + $0x58] sm:$0x7] }
   0xc   :  { %v113_v35 = vcombine.high %v91_v14, %v91_v14  ;;  %v162_v43 = vcombine.high %v140_v13, %v140_v13 }
   0xd   :  { %v328_v25 = vmul.f32 %v3251_v20, %v51_v17  ;;  %v311_v26 = vmul.f32 %v3254_v21, %v34_v18  ;;  %v312_v27 = vmul.f32 %v3254_v21, %v35_v19  ;;  %v3265_v28 = vrot.slane %v105_v22, %v3235_v11 }
   0xe   :  { %v327_v34 = vmul.f32 %v3251_v20, %v50_v29  ;;  %v3281_v39 = vrot.slane %v154_v24, %v3235_v11  ;;  %v3290_v42 = vrot.slane %v113_v35, %v3235_v11  ;;  %v3306_v52 = vrot.slane %v162_v43, %v3235_v11  ;;  %v59_v35 = vld [vmem:[%s5251_s2 + $0x64] sm:$0x7] }
   0xf   :  { %v395_v31 = vsel %vm343_vm0, %v328_v25, 0.0  ;;  %v344_v32 = vsel %vm343_vm0, %v311_v26, 0.0  ;;  %v313_v33 = vmul.f32 %v3265_v28, %v36_v23  ;;  %v347_v36 = vsel %vm343_vm0, %v312_v27, 0.0  ;;  %v43_v26 = vld [vmem:[%s5251_s2 + $0x24] sm:$0x7] }
  0x10   :  { %396 = vadd.xlane.f32.xlu1 %v395_v31  ;;  %345 = vadd.xlane.f32.xlu0 %v344_v32  ;;  %v314_v38 = vmul.f32 %v3265_v28, %v37_v30  ;;  %v392_v44 = vsel %vm343_vm0, %v327_v34, 0.0  ;;  %v329_v46 = vmul.f32 %v3281_v39, %v52_v40  ;;  %v330_v47 = vmul.f32 %v3281_v39, %v53_v41  ;;  %v42_v27 = vld [vmem:[%s5251_s2 + $0x20] sm:$0x7] }
  0x11   :  { %v350_v37 = vsel %vm343_vm0, %v313_v33, 0.0  ;;  %v315_v51 = vmul.f32 %v3290_v42, %v38_v48  ;;  %v316_v55 = vmul.f32 %v3290_v42, %v39_v49  ;;  %v115_v58 = vcombine.high %v105_v22, %v105_v22 }
  0x12   :  { %v353_v45 = vsel %vm343_vm0, %v314_v38, 0.0  ;;  %v398_v53 = vsel %vm343_vm0, %v329_v46, 0.0  ;;  %v401_v54 = vsel %vm343_vm0, %v330_v47, 0.0  ;;  %v331_v60 = vmul.f32 %v3306_v52, %v54_v56  ;;  %v45_v46 = vld [vmem:[%s5251_s2 + $0x2c] sm:$0x7] }
  0x13   :  { %v332_v61 = vmul.f32 %v3306_v52, %v55_v57  ;;  %v356_v63 = vsel %vm343_vm0, %v315_v51, 0.0  ;;  %v359_v0 = vsel %vm343_vm0, %v316_v55, 0.0  ;;  %v3325_v1 = vrot.slane %v115_v58, %v3235_v11  ;;  %v44_v47 = vld [vmem:[%s5251_s2 + $0x28] sm:$0x7] }
  0x14   :  { %348 = vadd.xlane.f32.xlu0 %v347_v36  ;;  %351 = vadd.xlane.f32.xlu1 %v350_v37  ;;  %v164_v2 = vcombine.high %v154_v24, %v154_v24  ;;  %v404_v5 = vsel %vm343_vm0, %v331_v60, 0.0  ;;  %v3349_v17 = vrot.slane %v98_v6, %v3235_v11  ;;  %v147_v18 = vrot.slane %v131_v8, %v3231_v9  ;;  %v58_v37 = vld [vmem:[%s5251_s2 + $0x60] sm:$0x7] }
  0x15   :  { %v407_v10 = vsel %vm343_vm0, %v332_v61, 0.0  ;;  %v318_v12 = vmul.f32 %v3325_v1, %v41_v3  ;;  %v317_v13 = vmul.f32 %v3325_v1, %v40_v4  ;;  %v84_v19 = vcombine.high %v82_v62, %v82_v62  ;;  %v47_v62 = vld [vmem:[%s5251_s2 + $0x34] sm:$0x7] }
  0x16   :  { %v3340_v14 = vrot.slane %v164_v2, %v3235_v11  ;;  %v320_v29 = vmul.f32 %v3349_v17, %v43_v26  ;;  %v3364_v30 = vrot.slane %v147_v18, %v3235_v11  ;;  %v133_v31 = vcombine.high %v131_v8, %v131_v8  ;;  %v63_v8 = vld [vmem:[%s5251_s2 + $0x74] sm:$0x7] }
  0x17   :  { %v365_v22 = vsel %vm343_vm0, %v318_v12, 0.0  ;;  %v362_v23 = vsel %vm343_vm0, %v317_v13, 0.0  ;;  %v319_v34 = vmul.f32 %v3349_v17, %v42_v27  ;;  %v112_v36 = vrot.slane %v84_v19, %v3231_v9 }
  0x18   :  { %393 = vadd.xlane.f32.xlu0 %v392_v44  ;;  %354 = vadd.xlane.f32.xlu1 %v353_v45  ;;  %v334_v24 = vmul.f32 %v3340_v14, %v57_v15  ;;  %v333_v25 = vmul.f32 %v3340_v14, %v56_v16  ;;  %v336_v38 = vmul.f32 %v3364_v30, %v59_v35  ;;  %v371_v41 = vsel %vm343_vm0, %v320_v29, 0.0 }
  0x19   :  { %v161_v40 = vrot.slane %v133_v31, %v3231_v9  ;;  %v368_v43 = vsel %vm343_vm0, %v319_v34, 0.0  ;;  %v335_v44 = vmul.f32 %v3364_v30, %v58_v37  ;;  %v3382_v45 = vrot.slane %v112_v36, %v3235_v11  ;;  %v65_v31 = vld [vmem:[%s5251_s2 + $0x7c] sm:$0x7]  ;;  %v19_v37 = vld [vmem:[%s5252_s1 + $0x4] sm:$0xf] }
  0x1a   :  { %v413_v32 = vsel %vm343_vm0, %v334_v24, 0.0  ;;  %v410_v33 = vsel %vm343_vm0, %v333_v25, 0.0  ;;  %v419_v9 = vsel %vm343_vm0, %v336_v38, 0.0  ;;  %v114_v55 = vcombine.high %v98_v6, %v98_v6 }
  0x1b   :  { %v3392_v48 = vrot.slane %v161_v40, %v3235_v11  ;;  %v416_v49 = vsel %vm343_vm0, %v335_v44, 0.0  ;;  %v322_v50 = vmul.f32 %v3382_v45, %v45_v46  ;;  %v321_v51 = vmul.f32 %v3382_v45, %v44_v47  ;;  %v26_v44 = vld [vmem:[%s5252_s1 + $0x20] sm:$0xf]  ;;  %v27_v46 = vld [vmem:[%s5252_s1 + $0x24] sm:$0xf] }
  0x1c   :  { %399 = vadd.xlane.f32.xlu0 %v398_v53  ;;  %402 = vadd.xlane.f32.xlu1 %v401_v54  ;;  %v61_v53 = vld [vmem:[%s5251_s2 + $0x6c] sm:$0x7]  ;;  %v60_v54 = vld [vmem:[%s5251_s2 + $0x68] sm:$0x7]  ;;  %v3408_v60 = vrot.slane %v114_v55, %v3235_v11  ;;  %v163_v61 = vcombine.high %v147_v18, %v147_v18  ;;  %v116_v2 = vcombine.high %v112_v36, %v112_v36  ;;  %v18_v36 = vld [vmem:[%s5252_s1] sm:$0xf] }
  0x1d   :  { %v338_v56 = vmul.f32 %v3392_v48, %v61_v53  ;;  %v337_v57 = vmul.f32 %v3392_v48, %v60_v54  ;;  %v377_v58 = vsel %vm343_vm0, %v322_v50, 0.0  ;;  %v374_v59 = vsel %vm343_vm0, %v321_v51, 0.0  ;;  %v28_v50 = vld [vmem:[%s5252_s1 + $0x28] sm:$0xf]  ;;  %v29_v55 = vld [vmem:[%s5252_s1 + $0x2c] sm:$0xf] }
  0x1e   :  { %v324_v4 = vmul.f32 %v3408_v60, %v47_v62  ;;  %v3421_v6 = vrot.slane %v163_v61, %v3235_v11  ;;  %v3430_v12 = vrot.slane %v116_v2, %v3235_v11  ;;  %v165_v13 = vcombine.high %v161_v40, %v161_v40 }
  0x1f   :  { %v422_v3 = vsel %vm343_vm0, %v337_v57, 0.0 }
  0x20   :  { %357 = vadd.xlane.f32.xlu0 %v356_v63  ;;  %360 = vadd.xlane.f32.xlu1 %v359_v0  ;;  %v46_v63 = vld [vmem:[%s5251_s2 + $0x30] sm:$0x7]  ;;  %v425_v0 = vsel %vm343_vm0, %v338_v56, 0.0  ;;  %v383_v15 = vsel %vm343_vm0, %v324_v4, 0.0  ;;  %v340_v18 = vmul.f32 %v3421_v6, %v63_v8  ;;  %v3443_v24 = vrot.slane %v165_v13, %v3235_v11 }
  0x22   :  { %v431_v25 = vsel %vm343_vm0, %v340_v18, 0.0  ;;  %v342_v34 = vmul.f32 %v3443_v24, %v65_v31 }
  0x24   :  { %405 = vadd.xlane.f32.xlu0 %v404_v5  ;;  %408 = vadd.xlane.f32.xlu1 %v407_v10  ;;  %v323_v5 = vmul.f32 %v3408_v60, %v46_v63  ;;  %v62_v10 = vld [vmem:[%s5251_s2 + $0x70] sm:$0x7]  ;;  %v437_v38 = vsel %vm343_vm0, %v342_v34, 0.0 }
  0x25   :  { %v339_v19 = vmul.f32 %v3421_v6, %v62_v10 }
  0x26   :  { %v380_v16 = vsel %vm343_vm0, %v323_v5, 0.0  ;;  %v32_v5 = vld [vmem:[%s5252_s1 + $0x38] sm:$0xf] }
  0x27   :  { %v428_v26 = vsel %vm343_vm0, %v339_v19, 0.0 }
  0x28   :  { %366 = vadd.xlane.f32.xlu1 %v365_v22  ;;  %363 = vadd.xlane.f32.xlu0 %v362_v23  ;;  %v49_v22 = vld [vmem:[%s5251_s2 + $0x3c] sm:$0x7]  ;;  %v48_v23 = vld [vmem:[%s5251_s2 + $0x38] sm:$0x7] }
  0x29   :  { %v326_v27 = vmul.f32 %v3430_v12, %v49_v22  ;;  %v325_v29 = vmul.f32 %v3430_v12, %v48_v23 }
  0x2b   :  { %v389_v11 = vsel %vm343_vm0, %v326_v27, 0.0 }
  0x2c   :  { %414 = vadd.xlane.f32.xlu1 %v413_v32  ;;  %411 = vadd.xlane.f32.xlu0 %v410_v33  ;;  %v64_v32 = vld [vmem:[%s5251_s2 + $0x78] sm:$0x7]  ;;  %v386_v33 = vsel %vm343_vm0, %v325_v29, 0.0 }
  0x2d   :  { %v341_v35 = vmul.f32 %v3443_v24, %v64_v32 }
  0x2f   :  { %v434_v40 = vsel %vm343_vm0, %v341_v35, 0.0 }
  0x30   :  { %372 = vadd.xlane.f32.xlu1 %v371_v41  ;;  %369 = vadd.xlane.f32.xlu0 %v368_v43  ;;  %v246_v41 = vmul.f32 %v3254_v21, %v18_v36  ;;  %v247_v43 = vmul.f32 %v3265_v28, %v19_v37  ;;  %v255_v21 = vmul.f32 %v3281_v39, %v27_v46  ;;  %v20_v28 = vld [vmem:[%s5252_s1 + $0x8] sm:$0xf]  ;;  %v21_v39 = vld [vmem:[%s5252_s1 + $0xc] sm:$0xf] }
  0x31   :  { %v248_v54 = vmul.f32 %v3290_v42, %v20_v28  ;;  %v257_v42 = vmul.f32 %v3340_v14, %v29_v55  ;;  %v23_v14 = vld [vmem:[%s5252_s1 + $0x14] sm:$0xf] }
  0x32   :  { %v263_v47 = vsel %vm262_vm1, %v246_v41, 0.0  ;;  %v290_v53 = vsel %vm262_vm1, %v255_v21, 0.0  ;;  %v251_v4 = vmul.f32 %v3382_v45, %v23_v14  ;;  %v260_v45 = vmul.f32 %v3421_v6, %v32_v5 }
  0x33   :  { %v269_v56 = vsel %vm262_vm1, %v248_v54, 0.0  ;;  %v296_v62 = vsel %vm262_vm1, %v257_v42, 0.0 }
  0x34   :  { %420 = vadd.xlane.f32.xlu1 %v419_v9  ;;  %417 = vadd.xlane.f32.xlu0 %v416_v49  ;;  %v266_v9 = vsel %vm262_vm1, %v247_v43, 0.0  ;;  %v254_v49 = vmul.f32 %v3251_v20, %v26_v44  ;;  %v256_v20 = vmul.f32 %v3306_v52, %v28_v50  ;;  %v22_v52 = vld [vmem:[%s5252_s1 + $0x10] sm:$0xf]  ;;  %v278_v8 = vsel %vm262_vm1, %v251_v4, 0.0 }
  0x35   :  { %v250_v63 = vmul.f32 %v3349_v17, %v22_v52  ;;  %v305_v18 = vsel %vm262_vm1, %v260_v45, 0.0 }
  0x36   :  { %v287_v51 = vsel %vm262_vm1, %v254_v49, 0.0  ;;  %v293_v57 = vsel %vm262_vm1, %v256_v20, 0.0 }
  0x37   :  { %v275_v2 = vsel %vm262_vm1, %v250_v63, 0.0 }
  0x38   :  { %378 = vadd.xlane.f32.xlu1 %v377_v58  ;;  %375 = vadd.xlane.f32.xlu0 %v374_v59  ;;  %v249_v58 = vmul.f32 %v3325_v1, %v21_v39  ;;  %v30_v59 = vld [vmem:[%s5252_s1 + $0x30] sm:$0xf] }
  0x39   :  { %v258_v1 = vmul.f32 %v3364_v30, %v30_v59  ;;  %v24_v30 = vld [vmem:[%s5252_s1 + $0x18] sm:$0xf] }
  0x3a   :  { %v272_v61 = vsel %vm262_vm1, %v249_v58, 0.0  ;;  %v252_v13 = vmul.f32 %v3408_v60, %v24_v30 }
  0x3c   :  { %426 = vadd.xlane.f32.xlu1 %v425_v0  ;;  %423 = vadd.xlane.f32.xlu0 %v422_v3  ;;  %v31_v0 = vld [vmem:[%s5252_s1 + $0x34] sm:$0xf]  ;;  %v299_v3 = vsel %vm262_vm1, %v258_v1, 0.0 }
  0x3d   :  { %v259_v17 = vmul.f32 %v3392_v48, %v31_v0  ;;  %v25_v48 = vld [vmem:[%s5252_s1 + $0x1c] sm:$0xf] }
  0x3e   :  { %v253_v19 = vmul.f32 %v3430_v12, %v25_v48 }
  0x3f   :  { %v302_v10 = vsel %vm262_vm1, %v259_v17, 0.0 }
  0x40   :  { %384 = vadd.xlane.f32.xlu1 %v383_v15  ;;  %381 = vadd.xlane.f32.xlu0 %v380_v16  ;;  %v33_v15 = vld [vmem:[%s5252_s1 + $0x3c] sm:$0xf]  ;;  %v281_v16 = vsel %vm262_vm1, %v252_v13, 0.0  ;;  %v284_v6 = vsel %vm262_vm1, %v253_v19, 0.0 }
  0x41   :  { %v261_v60 = vmul.f32 %v3443_v24, %v33_v15 }
  0x43   :  { %v308_v22 = vsel %vm262_vm1, %v261_v60, 0.0 }
  0x44   :  { %432 = vadd.xlane.f32.xlu1 %v431_v25  ;;  %429 = vadd.xlane.f32.xlu0 %v428_v26 }
  0x48   :  { %390 = vadd.xlane.f32.xlu1 %v389_v11  ;;  %387 = vadd.xlane.f32.xlu0 %v386_v33 }
  0x4c   :  { %438 = vadd.xlane.f32.xlu1 %v437_v38  ;;  %435 = vadd.xlane.f32.xlu0 %v434_v40 }
  0x50   :  { %264 = vadd.xlane.f32.xlu0 %v263_v47  ;;  %267 = vadd.xlane.f32.xlu1 %v266_v9 }
  0x54   :  { %288 = vadd.xlane.f32.xlu0 %v287_v51  ;;  %291 = vadd.xlane.f32.xlu1 %v290_v53 }
  0x58   :  { %270 = vadd.xlane.f32.xlu0 %v269_v56  ;;  %294 = vadd.xlane.f32.xlu1 %v293_v57 }
  0x5c   :  { %273 = vadd.xlane.f32.xlu0 %v272_v61  ;;  %297 = vadd.xlane.f32.xlu1 %v296_v62 }
  0x60   :  { %276 = vadd.xlane.f32.xlu0 %v275_v2  ;;  %300 = vadd.xlane.f32.xlu1 %v299_v3 }
  0x64   :  { %279 = vadd.xlane.f32.xlu0 %v278_v8  ;;  %303 = vadd.xlane.f32.xlu1 %v302_v10 }
  0x68   :  { %282 = vadd.xlane.f32.xlu0 %v281_v16  ;;  %306 = vadd.xlane.f32.xlu1 %v305_v18 }
  0x6c   :  { %285 = vadd.xlane.f32.xlu0 %v284_v6  ;;  %309 = vadd.xlane.f32.xlu1 %v308_v22 }
  0x9d   :  { %v397_v23 = vpop.xlane.xlu1 %396  ;;  %v346_v25 = vpop.xlane.xlu0 %345 }
  0x9e   :  { %v2719_v26 = vmul.f32 -1.442695, %v397_v23  ;;  %v2702_v27 = vmul.f32 -1.442695, %v346_v25 }
  0xa0   :  { %2737 = vpow2.f32 %v2719_v26 }
  0xa1   :  { %2739 = vpow2.f32 %v2702_v27  ;;  %v349_v29 = vpop.xlane.xlu0 %348  ;;  %v352_v31 = vpop.xlane.xlu1 %351 }
  0xa2   :  { %v2703_v32 = vmul.f32 -1.442695, %v349_v29  ;;  %v2704_v12 = vmul.f32 -1.442695, %v352_v31 }
  0xa4   :  { %2741 = vpow2.f32 %v2703_v32 }
  0xa5   :  { %2743 = vpow2.f32 %v2704_v12  ;;  %v394_v24 = vpop.xlane.xlu0 %393  ;;  %v355_v11 = vpop.xlane.xlu1 %354 }
  0xa6   :  { %v2718_v33 = vmul.f32 -1.442695, %v394_v24  ;;  %v2705_v34 = vmul.f32 -1.442695, %v355_v11 }
  0xa8   :  { %2745 = vpow2.f32 %v2718_v33 }
  0xa9   :  { %2747 = vpow2.f32 %v2705_v34  ;;  %v400_v35 = vpop.xlane.xlu0 %399  ;;  %v403_v36 = vpop.xlane.xlu1 %402 }
  0xaa   :  { %v2738_v37 = vpop.eup %2737  ;;  %v2720_v38 = vmul.f32 -1.442695, %v400_v35  ;;  %v2721_v43 = vmul.f32 -1.442695, %v403_v36 }
  0xab   :  { %v2740_v40 = vpop.eup %2739  ;;  %v649_v41 = vadd.f32 1.0, %v2738_v37 }
  0xac   :  { %v632_v44 = vadd.f32 1.0, %v2740_v40  ;;  %2749 = vpow2.f32 %v2720_v38 }
  0xad   :  { %2751 = vrcp.f32 %v649_v41  ;;  %v358_v46 = vpop.xlane.xlu0 %357  ;;  %v361_v47 = vpop.xlane.xlu1 %360 }
  0xae   :  { %v2742_v9 = vpop.eup %2741  ;;  %2753 = vrcp.f32 %v632_v44  ;;  %v2706_v49 = vmul.f32 -1.442695, %v358_v46  ;;  %v2707_v50 = vmul.f32 -1.442695, %v361_v47 }
  0xaf   :  { %v2744_v21 = vpop.eup %2743  ;;  %v633_v28 = vadd.f32 1.0, %v2742_v9  ;;  %2755 = vpow2.f32 %v2721_v43 }
  0xb0   :  { %v634_v51 = vadd.f32 1.0, %v2744_v21  ;;  %2757 = vpow2.f32 %v2706_v49 }
  0xb1   :  { %2759 = vrcp.f32 %v633_v28  ;;  %v406_v53 = vpop.xlane.xlu0 %405  ;;  %v409_v54 = vpop.xlane.xlu1 %408 }
  0xb2   :  { %v2746_v20 = vpop.eup %2745  ;;  %2761 = vrcp.f32 %v634_v51  ;;  %v2722_v39 = vmul.f32 -1.442695, %v406_v53  ;;  %v2723_v57 = vmul.f32 -1.442695, %v409_v54 }
  0xb3   :  { %v2748_v55 = vpop.eup %2747  ;;  %v648_v56 = vadd.f32 1.0, %v2746_v20  ;;  %2763 = vpow2.f32 %v2707_v50 }
  0xb4   :  { %v635_v58 = vadd.f32 1.0, %v2748_v55  ;;  %2765 = vpow2.f32 %v2722_v39 }
  0xb5   :  { %2767 = vrcp.f32 %v648_v56  ;;  %v367_v42 = vpop.xlane.xlu1 %366  ;;  %v364_v52 = vpop.xlane.xlu0 %363 }
  0xb6   :  { %v2750_v59 = vpop.eup %2749  ;;  %2769 = vrcp.f32 %v635_v58  ;;  %v2709_v61 = vmul.f32 -1.442695, %v367_v42  ;;  %v2708_v62 = vmul.f32 -1.442695, %v364_v52 }
  0xb7   :  { %v3541_v63 = vpop.eup %2751  ;;  %v650_v1 = vadd.f32 1.0, %v2750_v59  ;;  %2771 = vpow2.f32 %v2723_v57 }
  0xb8   :  { %v3543_v14 = vpop.eup %2753  ;;  %v1154_v0 = vand.u32 2147483647, %v3541_v63  ;;  %2773 = vpow2.f32 %v2709_v61  ;;  %v2039_v21 = vrot.slane %v3541_v63, %v3224_v7 }
  0xb9   :  { %v2756_v2 = vpop.eup %2755  ;;  %v1137_v3 = vand.u32 2147483647, %v3543_v14  ;;  %2775 = vrcp.f32 %v650_v1  ;;  %v415_v4 = vpop.xlane.xlu1 %414  ;;  %v1971_v29 = vrot.slane %v3543_v14, %v3224_v7 }
  0xba   :  { %v3547_v17 = vpop.xlane.xlu0 %411  ;;  %v2758_v30 = vpop.eup %2757  ;;  %v1186_v5 = vsub.f32 0.0, %v1154_v0  ;;  %v651_v8 = vadd.f32 1.0, %v2756_v2  ;;  %2777 = vpow2.f32 %v2708_v62  ;;  %v2725_v39 = vmul.f32 -1.442695, %v415_v4 }
  0xbb   :  { %v3549_v10 = vpop.eup %2759  ;;  %v1169_v13 = vsub.f32 0.0, %v1137_v3  ;;  %v636_v45 = vadd.f32 1.0, %v2758_v30  ;;  %v2724_v61 = vmul.f32 -1.442695, %v3547_v17 }
  0xbc   :  { %v3551_v48 = vpop.eup %2761  ;;  %v1235_v15 = vmul.f32 1.442695, %v1186_v5  ;;  %v1138_v16 = vand.u32 2147483647, %v3549_v10  ;;  %2779 = vrcp.f32 %v651_v8  ;;  %v1975_v18 = vrot.slane %v3549_v10, %v3224_v7 }
  0xbd   :  { %v2764_v19 = vpop.eup %2763  ;;  %v1201_v60 = vmul.f32 1.442695, %v1169_v13  ;;  %v1139_v6 = vand.u32 2147483647, %v3551_v48  ;;  %2781 = vrcp.f32 %v636_v45  ;;  %v373_v22 = vpop.xlane.xlu1 %372 }
  0xbe   :  { %v3557_v23 = vpop.xlane.xlu0 %369  ;;  %v2766_v25 = vpop.eup %2765  ;;  %2783 = vpow2.f32 %v1235_v15  ;;  %v1170_v26 = vsub.f32 0.0, %v1138_v16  ;;  %v637_v27 = vadd.f32 1.0, %v2764_v19  ;;  %v2096_v34 = vsel %vm1075_vm2, %v1975_v18, %v1971_v29 }
  0xbf   :  { %v3561_v31 = vpop.eup %2767  ;;  %2785 = vpow2.f32 %v1201_v60  ;;  %v1171_v32 = vsub.f32 0.0, %v1139_v6  ;;  %v652_v12 = vadd.f32 1.0, %v2766_v25  ;;  %v2128_v38 = vsel %vm1777_vm3, %v2096_v34, 0.0 }
  0xc0   :  { %v3563_v24 = vpop.eup %2769  ;;  %v1203_v11 = vmul.f32 1.442695, %v1170_v26  ;;  %v1153_v33 = vand.u32 2147483647, %v3561_v31  ;;  %2787 = vrcp.f32 %v637_v27  ;;  %2129 = vadd.xlane.f32.xlu0 %v2128_v38  ;;  %v2035_v53 = vrot.slane %v3561_v31, %v3224_v7 }
  0xc1   :  { %v2772_v35 = vpop.eup %2771  ;;  %v1205_v36 = vmul.f32 1.442695, %v1171_v32  ;;  %v1140_v37 = vand.u32 2147483647, %v3563_v24  ;;  %2789 = vrcp.f32 %v652_v12  ;;  %v421_v40 = vpop.xlane.xlu1 %420  ;;  %v2711_v3 = vmul.f32 -1.442695, %v373_v22 }
  0xc2   :  { %v3569_v41 = vpop.xlane.xlu0 %417  ;;  %v2774_v43 = vpop.eup %2773  ;;  %2791 = vpow2.f32 %v1203_v11  ;;  %v1185_v44 = vsub.f32 0.0, %v1153_v33  ;;  %v653_v46 = vadd.f32 1.0, %v2772_v35  ;;  %v2104_v42 = vsel %vm1075_vm2, %v2039_v21, %v2035_v53 }
  0xc3   :  { %v3571_v47 = vpop.eup %2775  ;;  %2793 = vpow2.f32 %v1205_v36  ;;  %v1172_v9 = vsub.f32 0.0, %v1140_v37  ;;  %v639_v49 = vadd.f32 1.0, %v2774_v43  ;;  %v2152_v62 = vsel %vm1777_vm3, %v2104_v42, 0.0 }
  0xc4   :  { %5285 = vst [vmem:[#allocation2_spill] sm:$0xff] %v3571_v47  ;;  %v2778_v28 = vpop.eup %2777  ;;  %v1233_v50 = vmul.f32 1.442695, %v1185_v44  ;;  %v1155_v51 = vand.u32 2147483647, %v3571_v47  ;;  %2795 = vrcp.f32 %v653_v46  ;;  %2153 = vadd.xlane.f32.xlu0 %v2152_v62  ;;  %v1979_v33 = vrot.slane %v3551_v48, %v3224_v7 }
  0xc5   :  { %v1207_v54 = vmul.f32 1.442695, %v1172_v9  ;;  %2797 = vrcp.f32 %v639_v49  ;;  %v638_v20 = vadd.f32 1.0, %v2778_v28  ;;  %v379_v55 = vpop.xlane.xlu1 %378  ;;  %v2710_v18 = vmul.f32 -1.442695, %v3557_v23 }
  0xc6   :  { %v376_v56 = vpop.xlane.xlu0 %375  ;;  %v3578_v57 = vpop.eup %2779  ;;  %2799 = vpow2.f32 %v1233_v50  ;;  %v1187_v58 = vsub.f32 0.0, %v1155_v51  ;;  %v2727_v22 = vmul.f32 -1.442695, %v421_v40  ;;  %v1983_v34 = vrot.slane %v3563_v24, %v3224_v7 }
  0xc7   :  { %5286 = vst [vmem:[#allocation3_spill] sm:$0xff] %v3578_v57  ;;  %v3581_v52 = vpop.eup %2781  ;;  %2801 = vpow2.f32 %v1207_v54  ;;  %v1156_v59 = vand.u32 2147483647, %v3578_v57  ;;  %v2726_v38 = vmul.f32 -1.442695, %v3569_v41  ;;  %v2047_v62 = vrot.slane %v3578_v57, %v3224_v7 }
  0xc8   :  { %v3586_v1 = vpop.eup %2783  ;;  %v1237_v0 = vmul.f32 1.442695, %v1187_v58  ;;  %v1141_v2 = vand.u32 2147483647, %v3581_v52  ;;  %2803 = vrcp.f32 %v638_v20  ;;  %v2713_v46 = vmul.f32 -1.442695, %v379_v55 }
  0xc9   :  { %v3589_v4 = vpop.eup %2785  ;;  %v1188_v30 = vsub.f32 0.0, %v1156_v59  ;;  %2805 = vpow2.f32 %v2725_v39  ;;  %v427_v5 = vpop.xlane.xlu1 %426  ;;  %v2712_v21 = vmul.f32 -1.442695, %v376_v56  ;;  %v1987_v50 = vrot.slane %v3581_v52, %v3224_v7 }
  0xca   :  { %v424_v8 = vpop.xlane.xlu0 %423  ;;  %v3591_v13 = vpop.eup %2787  ;;  %2807 = vpow2.f32 %v1237_v0  ;;  %v1173_v17 = vsub.f32 0.0, %v1141_v2  ;;  %v2097_v54 = vsel %vm1075_vm2, %v1983_v34, %v1979_v33  ;;  %v2043_v20 = vrot.slane %v3571_v47, %v3224_v7 }
  0xcb   :  { %v3593_v45 = vpop.eup %2789  ;;  %v1239_v15 = vmul.f32 1.442695, %v1188_v30  ;;  %v1142_v16 = vand.u32 2147483647, %v3591_v13  ;;  %2809 = vpow2.f32 %v2724_v61  ;;  %v1991_v56 = vrot.slane %v3591_v13, %v3224_v7 }
  0xcc   :  { %5287 = vst [vmem:[#allocation4_spill] sm:$0xff] %v3593_v45  ;;  %v3597_v19 = vpop.eup %2791  ;;  %v1209_v60 = vmul.f32 1.442695, %v1173_v17  ;;  %v1157_v6 = vand.u32 2147483647, %v3593_v45  ;;  %2811 = vpow2.f32 %v2711_v3 }
  0xcd   :  { %v3600_v25 = vpop.eup %2793  ;;  %2813 = vpow2.f32 %v1239_v15  ;;  %v1174_v26 = vsub.f32 0.0, %v1142_v16  ;;  %v385_v27 = vpop.xlane.xlu1 %384  ;;  %v2729_v3 = vmul.f32 -1.442695, %v427_v5  ;;  %v2728_v30 = vmul.f32 -1.442695, %v424_v8 }
  0xce   :  { %v3602_v29 = vpop.xlane.xlu0 %381  ;;  %v3606_v11 = vpop.eup %2795  ;;  %2815 = vpow2.f32 %v1209_v60  ;;  %v1189_v23 = vsub.f32 0.0, %v1157_v6  ;;  %v2051_v16 = vrot.slane %v3593_v45, %v3224_v7  ;;  %v2715_v8 = vmul.f32 -1.442695, %v385_v27 }
  0xcf   :  { %5288 = vst [vmem:[#allocation5_spill] sm:$0xff] %v3606_v11  ;;  %v3612_v35 = vpop.eup %2797  ;;  %v1211_v36 = vmul.f32 1.442695, %v1174_v26  ;;  %v1158_v37 = vand.u32 2147483647, %v3606_v11  ;;  %2817 = vpow2.f32 %v2710_v18  ;;  %v2055_v18 = vrot.slane %v3606_v11, %v3224_v7 }
  0xd0   :  { %5289 = vst [vmem:[#allocation6_spill] sm:$0xff] %v3612_v35  ;;  %v3616_v40 = vpop.eup %2799  ;;  %v1241_v43 = vmul.f32 1.442695, %v1189_v23  ;;  %v1144_v44 = vand.u32 2147483647, %v3612_v35  ;;  %2819 = vpow2.f32 %v2727_v22  ;;  %v3642_v23 = vsel %vm1777_vm3, %v2097_v54, 0.0 }
  0xd1   :  { %v3619_v9 = vpop.eup %2801  ;;  %2821 = vpow2.f32 %v1211_v36  ;;  %v1190_v49 = vsub.f32 0.0, %v1158_v37  ;;  %v433_v28 = vpop.xlane.xlu1 %432  ;;  %v2098_v34 = vsel %vm1075_vm2, %v1991_v56, %v1987_v50  ;;  %v2105_v36 = vsel %vm1075_vm2, %v2047_v62, %v2043_v20 }
  0xd2   :  { %v3623_v51 = vpop.eup %2803  ;;  %2823 = vpow2.f32 %v1241_v43  ;;  %v1176_v41 = vsub.f32 0.0, %v1144_v44  ;;  %v430_v53 = vpop.xlane.xlu0 %429  ;;  %v1999_v44 = vrot.slane %v3612_v35, %v3224_v7  ;;  %v2106_v27 = vsel %vm1075_vm2, %v2055_v18, %v2051_v16 }
  0xd3   :  { %5290 = vst [vmem:[#allocation7_spill] sm:$0xff] %v3623_v51  ;;  %v2806_v39 = vpop.eup %2805  ;;  %v1243_v55 = vmul.f32 1.442695, %v1190_v49  ;;  %v1143_v58 = vand.u32 2147483647, %v3623_v51  ;;  %2825 = vpow2.f32 %v2726_v38  ;;  %v1995_v43 = vrot.slane %v3623_v51, %v3224_v7 }
  0xd4   :  { %v3631_v42 = vpop.eup %2807  ;;  %v1215_v59 = vmul.f32 1.442695, %v1176_v41  ;;  %v655_v61 = vadd.f32 1.0, %v2806_v39  ;;  %2827 = vpow2.f32 %v2713_v46  ;;  %v2714_v38 = vmul.f32 -1.442695, %v3602_v29 }
  0xd5   :  { %5291 = vst [vmem:[#allocation8_spill] sm:$0xff] %v3631_v42  ;;  %v2810_v0 = vpop.eup %2809  ;;  %2829 = vpow2.f32 %v1243_v55  ;;  %v1175_v2 = vsub.f32 0.0, %v1143_v58  ;;  %v391_v26 = vpop.xlane.xlu1 %390  ;;  %v1268_v41 = vmul.f32 -0.5, %v3589_v4  ;;  %v3658_v20 = vsel %vm1777_vm3, %v2098_v34, 0.0 }
  0xd6   :  { %v2812_v17 = vpop.eup %2811  ;;  %2831 = vpow2.f32 %v1215_v59  ;;  %v654_v15 = vadd.f32 1.0, %v2810_v0  ;;  %v388_v33 = vpop.xlane.xlu0 %387  ;;  %v3661_v29 = vsel %vm1777_vm3, %v2105_v36, 0.0  ;;  %v2731_v55 = vmul.f32 -1.442695, %v433_v28 }
  0xd7   :  { %v3639_v60 = vpop.eup %2813  ;;  %v1213_v6 = vmul.f32 1.442695, %v1175_v2  ;;  %2833 = vrcp.f32 %v655_v61  ;;  %v641_v22 = vadd.f32 1.0, %v2812_v17  ;;  %v2730_v58 = vmul.f32 -1.442695, %v430_v53 }
  0xd8   :  { %5292 = vst [vmem:[#allocation9_spill] sm:$0xff] %v3639_v60  ;;  %v3644_v5 = vpop.eup %2815  ;;  %2835 = vrcp.f32 %v654_v15  ;;  %v2717_v56 = vmul.f32 -1.442695, %v391_v26  ;;  %v2716_v61 = vmul.f32 -1.442695, %v388_v33  ;;  %v3666_v0 = vsel %vm1777_vm3, %v2106_v27, 0.0 }
  0xd9   :  { %v2818_v37 = vpop.eup %2817  ;;  %2837 = vpow2.f32 %v1213_v6  ;;  %v439_v62 = vpop.xlane.xlu1 %438  ;;  %v1269_v18 = vadd.f32 1.0, %v1268_v41  ;;  %v3673_v53 = vadd.f32 1.0, %v3589_v4  ;;  %v5312_v47 = vand.u32 2147483647, %v3597_v19 }
  0xda   :  { %v2820_v46 = vpop.eup %2819  ;;  %2839 = vrcp.f32 %v641_v22  ;;  %v640_v49 = vadd.f32 1.0, %v2818_v37  ;;  %v436_v15 = vpop.xlane.xlu0 %435  ;;  %v1277_v22 = vmul.f32 -0.5, %v3597_v19  ;;  %v3678_v33 = vmul.f32 -1.442695, %v439_v62 }
  0xdb   :  { %v3655_v50 = vpop.eup %2821  ;;  %v657_v54 = vadd.f32 1.0, %v2820_v46  ;;  %2841 = vpow2.f32 %v2712_v21  ;;  %v2099_v21 = vsel %vm1075_vm2, %v1999_v44, %v1995_v43  ;;  %v3686_v37 = vmul.f32 -1.442695, %v436_v15 }
  0xdc   :  { %v3663_v39 = vpop.eup %2823  ;;  %2843 = vrcp.f32 %v640_v49  ;;  %v3696_v49 = vmul.f32 %v3589_v4, %v1269_v18  ;;  %v3705_v62 = vadd.f32 1.0, %v3616_v40  ;;  %vm3861_vm5 = vcmp.lt.f32.partialorder %v5312_v47, 0.0004427343 }
  0xdd   :  { %5293 = vst [vmem:[#allocation10_spill] sm:$0xff] %v3663_v39  ;;  %v2826_v59 = vpop.eup %2825  ;;  %2845 = vrcp.f32 %v657_v54 }
  0xde   :  { %v2828_v2 = vpop.eup %2827  ;;  %v656_v17 = vadd.f32 1.0, %v2826_v59  ;;  %2847 = vpow2.f32 %v2729_v3  ;;  %v3681_v3 = vsel %vm1777_vm3, %v2099_v21, 0.0  ;;  %v3702_v59 = vadd.f32 1.0, %v1277_v22 }
  0xdf   :  { %v3670_v6 = vpop.eup %2829  ;;  %v643_v28 = vadd.f32 1.0, %v2828_v2  ;;  %2849 = vpow2.f32 %v2728_v30  ;;  %v3689_v30 = vadd.f32 1.0, %v3597_v19 }
  0xe0   :  { %5294 = vst [vmem:[#allocation11_spill] sm:$0xff] %v3670_v6  ;;  %v3676_v26 = vpop.eup %2831  ;;  %2851 = vrcp.f32 %v656_v17  ;;  %v1421_v17 = vmul.f32 -0.5, %v3586_v1 }
  0xe1   :  { %5295 = vst [vmem:[#allocation12_spill] sm:$0xff] %v3676_v26  ;;  %v3684_v36 = vpop.eup %2833  ;;  %2853 = vrcp.f32 %v643_v28 }
  0xe2   :  { %5296 = vst [vmem:[#allocation13_spill] sm:$0xff] %v3684_v36  ;;  %v3692_v44 = vpop.eup %2835  ;;  %v1160_v46 = vand.u32 2147483647, %v3684_v36  ;;  %2855 = vpow2.f32 %v2715_v8  ;;  %v1412_v8 = vmul.f32 -0.5, %v3616_v40 }
  0xe3   :  { %5297 = vst [vmem:[#allocation14_spill] sm:$0xff] %v3692_v44  ;;  %v3699_v41 = vpop.eup %2837  ;;  %v1159_v54 = vand.u32 2147483647, %v3692_v44  ;;  %2857 = vpow2.f32 %v2714_v38 }
  0xe4   :  { %5298 = vst [vmem:[#allocation15_spill] sm:$0xff] %v3699_v41  ;;  %v3707_v21 = vpop.eup %2839  ;;  %v1192_v2 = vsub.f32 0.0, %v1160_v46  ;;  %2859 = vpow2.f32 %v2731_v55 }
  0xe5   :  { %v2842_v15 = vpop.eup %2841  ;;  %v1191_v18 = vsub.f32 0.0, %v1159_v54  ;;  %v1146_v28 = vand.u32 2147483647, %v3707_v21  ;;  %2861 = vpow2.f32 %v2730_v58  ;;  %v2007_v55 = vrot.slane %v3707_v21, %v3224_v7 }
  0xe6   :  { %v3714_v22 = vpop.eup %2843  ;;  %v1247_v12 = vmul.f32 1.442695, %v1192_v2  ;;  %v642_v27 = vadd.f32 1.0, %v2842_v15  ;;  %2863 = vpow2.f32 %v2717_v56 }
  0xe7   :  { %v3718_v46 = vpop.eup %2845  ;;  %v1245_v16 = vmul.f32 1.442695, %v1191_v18  ;;  %v1178_v32 = vsub.f32 0.0, %v1146_v28  ;;  %v1145_v54 = vand.u32 2147483647, %v3714_v22  ;;  %2865 = vpow2.f32 %v2716_v61 }
  0xe8   :  { %v2848_v43 = vpop.eup %2847  ;;  %2867 = vpow2.f32 %v1247_v12  ;;  %v1162_v58 = vand.u32 2147483647, %v3718_v46  ;;  %v2003_v34 = vrot.slane %v3714_v22, %v3224_v7  ;;  %v2071_v56 = vrot.slane %v3718_v46, %v3224_v7 }
  0xe9   :  { %v2850_v2 = vpop.eup %2849  ;;  %2869 = vpow2.f32 %v1245_v16  ;;  %v1219_v15 = vmul.f32 1.442695, %v1178_v32  ;;  %v1177_v38 = vsub.f32 0.0, %v1145_v54  ;;  %v659_v35 = vadd.f32 1.0, %v2848_v43 }
  0xea   :  { %v3726_v18 = vpop.eup %2851  ;;  %v1194_v28 = vsub.f32 0.0, %v1162_v58  ;;  %2871 = vrcp.f32 %v642_v27  ;;  %v658_v61 = vadd.f32 1.0, %v2850_v2  ;;  %v2100_v12 = vsel %vm1075_vm2, %v2007_v55, %v2003_v34 }
  0xeb   :  { %v3729_v51 = vpop.eup %2853  ;;  %2873 = vpow2.f32 %v1219_v15  ;;  %v1217_v26 = vmul.f32 1.442695, %v1177_v38  ;;  %v1161_v41 = vand.u32 2147483647, %v3726_v18  ;;  %v2140_v11 = vsel %vm1777_vm3, %v2100_v12, 0.0 }
  0xec   :  { %5299 = vst [vmem:[#allocation16_spill] sm:$0xff] %v3729_v51  ;;  %v2856_v45 = vpop.eup %2855  ;;  %v1251_v16 = vmul.f32 1.442695, %v1194_v28  ;;  %v1148_v32 = vand.u32 2147483647, %v3729_v51  ;;  %2875 = vrcp.f32 %v659_v35  ;;  %2141 = vadd.xlane.f32.xlu0 %v2140_v11  ;;  %v2067_v43 = vrot.slane %v3726_v18, %v3224_v7 }
  0xed   :  { %v2858_v27 = vpop.eup %2857  ;;  %2877 = vpow2.f32 %v1217_v26  ;;  %v1193_v34 = vsub.f32 0.0, %v1161_v41  ;;  %v645_v55 = vadd.f32 1.0, %v2856_v45  ;;  %v2059_v38 = vrot.slane %v3692_v44, %v3224_v7 }
  0xee   :  { %v2860_v54 = vpop.eup %2859  ;;  %2879 = vpow2.f32 %v1251_v16  ;;  %v1180_v58 = vsub.f32 0.0, %v1148_v32  ;;  %v2108_v2 = vsel %vm1075_vm2, %v2071_v56, %v2067_v43  ;;  %v1413_v15 = vadd.f32 1.0, %v1412_v8 }
  0xef   :  { %v2862_v28 = vpop.eup %2861  ;;  %v1249_v12 = vmul.f32 1.442695, %v1193_v34  ;;  %2881 = vrcp.f32 %v658_v61  ;;  %v644_v11 = vadd.f32 1.0, %v2858_v27  ;;  %v2164_v35 = vsel %vm1777_vm3, %v2108_v2, 0.0 }
  0xf0   :  { %v2864_v6 = vpop.eup %2863  ;;  %v1223_v57 = vmul.f32 1.442695, %v1180_v58  ;;  %2883 = vrcp.f32 %v645_v55  ;;  %v661_v26 = vadd.f32 1.0, %v2860_v54  ;;  %2165 = vadd.xlane.f32.xlu1 %v2164_v35  ;;  %2135 = vadd.xlane.f32.xlu0 %v3658_v20  ;;  %v1422_v45 = vadd.f32 1.0, %v1421_v17 }
  0xf1   :  { %v2866_v41 = vpop.eup %2865  ;;  %2885 = vpow2.f32 %v1249_v12  ;;  %v660_v16 = vadd.f32 1.0, %v2862_v28  ;;  %v5300_v8 = vrot.slane %v3684_v36, %v3224_v7  ;;  %v647_v43 = vadd.f32 1.0, %v2864_v6 }
  0xf2   :  { %v3746_v32 = vpop.eup %2867  ;;  %2887 = vpow2.f32 %v1223_v57  ;;  %v3750_v27 = vmul.f32 %v3597_v19, %v3702_v59  ;;  %v3753_v20 = vadd.f32 1.0, %v3586_v1  ;;  %v646_v34 = vadd.f32 1.0, %v2866_v41 }
  0xf3   :  { %v2107_v56 = vsel %vm1075_vm2, %v5300_v8, %v2059_v38  ;;  %5301 = vst [vmem:[#allocation17_spill] sm:$0xff] %v3746_v32  ;;  %v3755_v17 = vpop.eup %2869  ;;  %2889 = vrcp.f32 %v644_v11  ;;  %v2015_v55 = vrot.slane %v3729_v51, %v3224_v7  ;;  %v3767_v6 = vmul.f32 %v3616_v40, %v1413_v15 }
  0xf4   :  { %5302 = vst [vmem:[#allocation18_spill] sm:$0xff] %v3755_v17  ;;  %v3760_v54 = vpop.eup %2871  ;;  %2891 = vrcp.f32 %v661_v26  ;;  %2132 = vadd.xlane.f32.xlu1 %v3642_v23  ;;  %v3764_v57 = vsel %vm1777_vm3, %v2107_v56, 0.0  ;;  %v3770_v59 = vmul.f32 %v3586_v1, %v1422_v45  ;;  %v3821_v11 = vadd.f32 1.0, %v3655_v50 }
  0xf5   :  { %v3772_v58 = vpop.eup %2873  ;;  %v1147_v2 = vand.u32 2147483647, %v3760_v54  ;;  %2893 = vrcp.f32 %v660_v16  ;;  %v2011_v28 = vrot.slane %v3760_v54, %v3224_v7  ;;  %v5316_v19 = vand.u32 2147483647, %v3616_v40 }
  0xf6   :  { %v3778_v23 = vpop.eup %2875  ;;  %2895 = vrcp.f32 %v647_v43  ;;  %v3818_v16 = vmul.f32 -0.5, %v3772_v58 }
  0xf7   :  { %5303 = vst [vmem:[#allocation19_spill] sm:$0xff] %v3778_v23  ;;  %v3783_v26 = vpop.eup %2877  ;;  %v1164_v45 = vand.u32 2147483647, %v3778_v23  ;;  %2897 = vrcp.f32 %v646_v34  ;;  %v2101_v41 = vsel %vm1075_vm2, %v2015_v55, %v2011_v28  ;;  %v2079_v43 = vrot.slane %v3778_v23, %v3224_v7 }
  0xf8   :  { %v3788_v8 = vpop.eup %2879  ;;  %2899 = vpow2.f32 %v3678_v33  ;;  %v2143_v56 = vsel %vm1777_vm3, %v2101_v41, 0.0  ;;  %2156 = vadd.xlane.f32.xlu1 %v3661_v29  ;;  %v1179_v34 = vsub.f32 0.0, %v1147_v2  ;;  %v3800_v55 = vadd.f32 1.0, %v3644_v5 }
  0xf9   :  { %v3796_v15 = vpop.eup %2881  ;;  %2901 = vpow2.f32 %v3686_v37  ;;  %2144 = vadd.xlane.f32.xlu0 %v2143_v56  ;;  %v3803_v33 = vmul.f32 -0.5, %v3644_v5  ;;  %v1196_v29 = vsub.f32 0.0, %v1164_v45  ;;  %v3815_v56 = vadd.f32 1.0, %v3772_v58 }
  0xfa   :  { %5304 = vst [vmem:[#allocation20_spill] sm:$0xff] %v3796_v15  ;;  %v3805_v28 = vpop.eup %2883  ;;  %v1163_v41 = vand.u32 2147483647, %v3796_v15  ;;  %v2075_v35 = vrot.slane %v3796_v15, %v3224_v7  ;;  %2903 = vlog2.f32 %v3673_v53  ;;  %v1221_v36 = vmul.f32 1.442695, %v1179_v34 }
  0xfb   :  { %5305 = vst [vmem:[#allocation21_spill] sm:$0xff] %v3805_v28  ;;  %v3811_v2 = vpop.eup %2885  ;;  %v1150_v37 = vand.u32 2147483647, %v3805_v28  ;;  %v2023_v53 = vrot.slane %v3805_v28, %v3224_v7  ;;  %2905 = vlog2.f32 %v3689_v30  ;;  %v3833_v32 = vadd.f32 1.0, %v3783_v26 }
  0xfc   :  { %v3823_v45 = vpop.eup %2887  ;;  %v1195_v12 = vsub.f32 0.0, %v1163_v41  ;;  %2159 = vadd.xlane.f32.xlu1 %v3666_v0  ;;  %v2109_v38 = vsel %vm1075_vm2, %v2079_v43, %v2075_v35  ;;  %v3836_v17 = vmul.f32 -0.5, %v3783_v26  ;;  %v1255_v0 = vmul.f32 1.442695, %v1196_v29 }
  0xfd   :  { %v3830_v61 = vpop.eup %2889  ;;  %v1182_v44 = vsub.f32 0.0, %v1150_v37  ;;  %2907 = vlog2.f32 %v3705_v62  ;;  %v2167_v37 = vsel %vm1777_vm3, %v2109_v38, 0.0  ;;  %v5309_v15 = vand.u32 2147483647, %v3589_v4 }
  0xfe   :  { %5306 = vst [vmem:[#allocation22_spill] sm:$0xff] %v3830_v61  ;;  %v3838_v41 = vpop.eup %2891  ;;  %v1149_v23 = vand.u32 2147483647, %v3830_v61  ;;  %v2019_v35 = vrot.slane %v3830_v61, %v3224_v7  ;;  %v1253_v43 = vmul.f32 1.442695, %v1195_v12  ;;  %2909 = vlog2.f32 %v3753_v20 }
  0xff   :  { %5307 = vst [vmem:[#allocation23_spill] sm:$0xff] %v3838_v41  ;;  %v3844_v30 = vpop.eup %2893  ;;  %v1166_v34 = vand.u32 2147483647, %v3838_v41  ;;  %vm3850_vm4 = vcmp.lt.f32.partialorder %v5309_v15, 0.0004427343  ;;  %2911 = vpow2.f32 %v1221_v36 }
 0x100   :  { %5308 = vst [vmem:[#allocation24_spill] sm:$0xff] %v3844_v30  ;;  %v3855_v29 = vpop.eup %2895  ;;  %v1227_v61 = vmul.f32 1.442695, %v1182_v44  ;;  %v1181_v39 = vsub.f32 0.0, %v1149_v23  ;;  %v1165_v62 = vand.u32 2147483647, %v3844_v30  ;;  %v2102_v12 = vsel %vm1075_vm2, %v2023_v53, %v2019_v35  ;;  %2168 = vadd.xlane.f32.xlu1 %v2167_v37 }
 0x101   :  { %v3865_v4 = vpop.eup %2897  ;;  %v1198_v15 = vsub.f32 0.0, %v1166_v34  ;;  %v1152_v20 = vand.u32 2147483647, %v3855_v29  ;;  %v2146_v60 = vsel %vm1777_vm3, %v2102_v12, 0.0  ;;  %v2087_v44 = vrot.slane %v3838_v41, %v3224_v7 }
 0x102   :  { %5315 = vst [vmem:[#allocation25_spill] sm:$0xff] %v3865_v4  ;;  %v2900_v23 = vpop.eup %2899  ;;  %v1225_v53 = vmul.f32 1.442695, %v1181_v39  ;;  %v1197_v35 = vsub.f32 0.0, %v1165_v62  ;;  %2147 = vadd.xlane.f32.xlu0 %v2146_v60  ;;  %v2083_v47 = vrot.slane %v3844_v30, %v3224_v7  ;;  %vm3875_vm6 = vcmp.lt.f32.partialorder %v5316_v19, 0.0004427343 }
 0x103   :  { %v2902_v34 = vpop.eup %2901  ;;  %2913 = vpow2.f32 %v1255_v0  ;;  %v1259_v12 = vmul.f32 1.442695, %v1198_v15  ;;  %v1151_v42 = vand.u32 2147483647, %v3865_v4  ;;  %v2027_v36 = vrot.slane %v3865_v4, %v3224_v7 }
 0x104   :  { %v5319_v39 = vand.u32 2147483647, %v3586_v1  ;;  %v2904_v62 = vpop.eup %2903  ;;  %2915 = vpow2.f32 %v1253_v43  ;;  %v1257_v40 = vmul.f32 1.442695, %v1197_v35  ;;  %v1184_v19 = vsub.f32 0.0, %v1152_v20 }
 0x105   :  { %v1343_v41 = vand.u32 2147483647, %v3783_v26  ;;  %2917 = vpow2.f32 %v1227_v61  ;;  %v663_v0 = vadd.f32 1.0, %v2900_v23  ;;  %v2110_v15 = vsel %vm1075_vm2, %v2087_v44, %v2083_v47  ;;  %v2906_v4 = vpop.eup %2905 }
 0x106   :  { %vm3884_vm7 = vcmp.lt.f32.partialorder %v5319_v39, 0.0004427343  ;;  %v2031_v30 = vrot.slane %v3855_v29, %v3224_v7  ;;  %2919 = vpow2.f32 %v1225_v53  ;;  %v662_v1 = vadd.f32 1.0, %v2902_v34  ;;  %2138 = vadd.xlane.f32.xlu0 %v3681_v3 }
 0x107   :  { %v2170_v39 = vsel %vm1777_vm3, %v2110_v15, 0.0  ;;  %v1267_v51 = vmul.f32 0.6931472, %v2904_v62  ;;  %2921 = vpow2.f32 %v1259_v12  ;;  %v1183_v43 = vsub.f32 0.0, %v1151_v42  ;;  %v2908_v23 = vpop.eup %2907 }
 0x108   :  { %2171 = vadd.xlane.f32.xlu1 %v2170_v39  ;;  %v2103_v20 = vsel %vm1075_vm2, %v2031_v30, %v2027_v36  ;;  %v1276_v61 = vmul.f32 0.6931472, %v2906_v4  ;;  %2923 = vpow2.f32 %v1257_v40  ;;  %v1231_v44 = vmul.f32 1.442695, %v1184_v19  ;;  %v2910_v47 = vpop.eup %2909 }
 0x109   :  { %v2149_v35 = vsel %vm1777_vm3, %v2103_v20, 0.0  ;;  %v1273_v53 = vsel %vm3850_vm4, %v3696_v49, %v1267_v51  ;;  %2925 = vrcp.f32 %v663_v0  ;;  %v5322_v42 = vmax.f32 %v3543_v14, 0.0  ;;  %v3913_v14 = vpop.eup %2911 }
 0x10a   :  { %v1282_v3 = vsel %vm3861_vm5, %v3750_v27, %v1276_v61  ;;  %v1411_v30 = vmul.f32 0.6931472, %v2908_v23  ;;  %2927 = vrcp.f32 %v662_v1  ;;  %2150 = vadd.xlane.f32.xlu0 %v2149_v35  ;;  %v5323_v4 = vmax.f32 %v3549_v10, 0.0 }
 0x10b   :  { %v1553_v34 = vadd.f32 %v1273_v53, %v5322_v42  ;;  %v1420_v36 = vmul.f32 0.6931472, %v2910_v47  ;;  %v1341_v62 = vadd.f32 1.0, %v3836_v17  ;;  %v1229_v28 = vmul.f32 1.442695, %v1183_v43 }
 0x10c   :  { %v1554_v12 = vadd.f32 %v1282_v3, %v5323_v4  ;;  %2162 = vadd.xlane.f32.xlu1 %v3764_v57  ;;  %v1417_v49 = vsel %vm3875_vm6, %v3767_v6, %v1411_v30  ;;  %2929 = vlog2.f32 %v3833_v32  ;;  %v5324_v17 = vmax.f32 %v3561_v31, 0.0 }
 0x10d   :  { %v1620_v51 = vrot.slane %v1553_v34, %v3224_v7  ;;  %v1426_v10 = vsel %vm3884_vm7, %v3770_v59, %v1420_v36  ;;  %2931 = vlog2.f32 %v3815_v56  ;;  %v3922_v57 = vpop.eup %2913  ;;  %v5325_v6 = vmax.f32 %v3541_v63, 0.0 }
 0x10e   :  { %v1624_v27 = vrot.slane %v1554_v12, %v3224_v7  ;;  %v1569_v38 = vadd.f32 %v1417_v49, %v5324_v17  ;;  %2933 = vpow2.f32 %v1231_v44  ;;  %v1481_v32 = vadd.f32 1.0, %v3811_v2  ;;  %v3928_v19 = vpop.eup %2915 }
 0x10f   :  { %v1570_v37 = vadd.f32 %v1426_v10, %v5325_v6  ;;  %v1484_v40 = vmul.f32 -0.5, %v3811_v2  ;;  %v1490_v31 = vadd.f32 1.0, %v3788_v8  ;;  %v1493_v56 = vmul.f32 -0.5, %v3788_v8  ;;  %v3934_v0 = vpop.eup %2917 }
 0x110   :  { %v1745_v60 = vsel %vm1075_vm2, %v1624_v27, %v1620_v51  ;;  %v1684_v59 = vrot.slane %v1569_v38, %v3224_v7  ;;  %v1350_v1 = vadd.f32 1.0, %v3818_v16  ;;  %2935 = vlog2.f32 %v1481_v32  ;;  %v3939_v39 = vpop.eup %2919 }
 0x111   :  { %v1778_v15 = vsel %vm1777_vm3, %v1745_v60, 0.0  ;;  %v1688_v63 = vrot.slane %v1570_v37, %v3224_v7  ;;  %v1352_v43 = vand.u32 2147483647, %v3772_v58  ;;  %v1487_v20 = vand.u32 2147483647, %v3811_v2  ;;  %v3944_v23 = vpop.eup %2921 }
 0x112   :  { %1779 = vadd.xlane.f32.xlu0 %v1778_v15  ;;  %2937 = vlog2.f32 %v1490_v31  ;;  %v1307_v61 = vand.u32 2147483647, %v3644_v5  ;;  %v1485_v35 = vadd.f32 1.0, %v1484_v40  ;;  %v1494_v53 = vadd.f32 1.0, %v1493_v56  ;;  %v3948_v16 = vpop.eup %2923 }
 0x113   :  { %v1753_v44 = vsel %vm1075_vm2, %v1688_v63, %v1684_v59  ;;  %2939 = vlog2.f32 %v3800_v55  ;;  %vm3952_vm8 = vcmp.lt.f32.partialorder %v1343_v41, 0.0004427343  ;;  %v1496_v3 = vand.u32 2147483647, %v3788_v8  ;;  %v3958_v34 = vpop.eup %2925 }
 0x114   :  { %2941 = vpow2.f32 %v1229_v28  ;;  %v1313_v42 = vmul.f32 -0.5, %v3655_v50  ;;  %v1802_v30 = vsel %vm1777_vm3, %v1753_v44, 0.0  ;;  %v1342_v4 = vmul.f32 %v3783_v26, %v1341_v62  ;;  %v3964_v12 = vpop.eup %2927 }
 0x115   :  { %v1351_v55 = vmul.f32 %v3772_v58, %v1350_v1  ;;  %2943 = vlog2.f32 %v3821_v11  ;;  %v2095_v41 = vrot.slane %v3958_v34, %v3224_v7  ;;  %vm3968_vm9 = vcmp.lt.f32.partialorder %v1352_v43, 0.0004427343 }
 0x116   :  { %1803 = vadd.xlane.f32.xlu0 %v1802_v30  ;;  %vm3972_vm10 = vcmp.lt.f32.partialorder %v1487_v20, 0.0004427343  ;;  %v1305_v26 = vadd.f32 1.0, %v3803_v33  ;;  %v2930_v62 = vpop.eup %2929  ;;  %v1168_v58 = vand.u32 2147483647, %v3958_v34  ;;  %v2091_v11 = vrot.slane %v3964_v12, %v3224_v7 }
 0x117   :  { %v1486_v51 = vmul.f32 %v3811_v2, %v1485_v35  ;;  %v1495_v49 = vmul.f32 %v3788_v8, %v1494_v53  ;;  %v2932_v27 = vpop.eup %2931  ;;  %v1339_v10 = vmul.f32 0.6931472, %v2930_v62  ;;  %vm3982_vm11 = vcmp.lt.f32.partialorder %v1496_v3, 0.0004427343 }
 0x118   :  { %v1314_v38 = vadd.f32 1.0, %v1313_v42  ;;  %v1283_v6 = vadd.f32 1.0, %v3600_v25  ;;  %v3987_v33 = vpop.eup %2933  ;;  %v2111_v37 = vsel %vm1075_vm2, %v2095_v41, %v2091_v11  ;;  %v1348_v32 = vmul.f32 0.6931472, %v2932_v27 }
 0x119   :  { %vm3990_vm12 = vcmp.lt.f32.partialorder %v1307_v61, 0.0004427343  ;;  %v1316_v8 = vand.u32 2147483647, %v3655_v50  ;;  %v2173_v2 = vsel %vm1777_vm3, %v2111_v37, 0.0  ;;  %v1345_v60 = vsel %vm3952_vm8, %v1342_v4, %v1339_v10 }
 0x11a   :  { %v1306_v59 = vmul.f32 %v3644_v5, %v1305_v26  ;;  %2945 = vlog2.f32 %v1283_v6  ;;  %v2936_v31 = vpop.eup %2935  ;;  %v1200_v56 = vsub.f32 0.0, %v1168_v58  ;;  %v1167_v15 = vand.u32 2147483647, %v3964_v12  ;;  %2174 = vadd.xlane.f32.xlu1 %v2173_v2 }
 0x11b   :  { %v1354_v63 = vsel %vm3968_vm9, %v1351_v55, %v1348_v32  ;;  %v5336_v1 = vmax.f32 %v3714_v22, 0.0  ;;  %v5337_v61 = vmax.f32 %v3707_v21, 0.0  ;;  %v1483_v35 = vmul.f32 0.6931472, %v2936_v31 }
 0x11c   :  { %v2938_v20 = vpop.eup %2937  ;;  %v1315_v53 = vmul.f32 %v3655_v50, %v1314_v38  ;;  %v1107_v5 = vmax.f32 %v3551_v48, 0.0  ;;  %vm4009_vm13 = vcmp.lt.f32.partialorder %v1316_v8, 0.0004427343  ;;  %v1286_v22 = vmul.f32 -0.5, %v3600_v25 }
 0x11d   :  { %v1561_v43 = vadd.f32 %v1345_v60, %v5336_v1  ;;  %v1562_v44 = vadd.f32 %v1354_v63, %v5337_v61  ;;  %v2940_v47 = vpop.eup %2939  ;;  %v1492_v42 = vmul.f32 0.6931472, %v2938_v20  ;;  %v1489_v55 = vsel %vm3972_vm10, %v1486_v51, %v1483_v35 }
 0x11e   :  { %v4014_v4 = vpop.eup %2941  ;;  %v1303_v50 = vmul.f32 0.6931472, %v2940_v47  ;;  %v1292_v41 = vadd.f32 1.0, %v3619_v9  ;;  %v1263_v26 = vmul.f32 1.442695, %v1200_v56  ;;  %v1199_v62 = vsub.f32 0.0, %v1167_v15 }
 0x11f   :  { %v1652_v3 = vrot.slane %v1561_v43, %v3224_v7  ;;  %v1656_v21 = vrot.slane %v1562_v44, %v3224_v7  ;;  %v2944_v36 = vpop.eup %2943  ;;  %v1498_v58 = vsel %vm3982_vm11, %v1495_v49, %v1492_v42  ;;  %v5340_v11 = vmax.f32 %v3726_v18, 0.0 }
 0x120   :  { %v5341_v38 = vmax.f32 %v3718_v46, 0.0  ;;  %v1309_v28 = vsel %vm3990_vm12, %v1306_v59, %v1303_v50  ;;  %v1312_v51 = vmul.f32 0.6931472, %v2944_v36  ;;  %v5342_v8 = vmax.f32 %v3581_v52, 0.0 }
 0x121   :  { %v1577_v27 = vadd.f32 %v1489_v55, %v5340_v11  ;;  %v1749_v10 = vsel %vm1075_vm2, %v1656_v21, %v1652_v3  ;;  %2947 = vlog2.f32 %v1292_v41  ;;  %v1287_v46 = vadd.f32 1.0, %v1286_v22 }
 0x122   :  { %v1578_v6 = vadd.f32 %v1498_v58, %v5341_v38  ;;  %v1790_v37 = vsel %vm1777_vm3, %v1749_v10, 0.0  ;;  %v1557_v17 = vadd.f32 %v1309_v28, %v5342_v8  ;;  %v1318_v49 = vsel %vm4009_vm13, %v1315_v53, %v1312_v51  ;;  %v5352_v28 = vld [vmem:[#allocation9_spill] sm:$0xff] }
 0x123   :  { %v1716_v32 = vrot.slane %v1577_v27, %v3224_v7  ;;  %1791 = vadd.xlane.f32.xlu0 %v1790_v37  ;;  %v1295_v2 = vmul.f32 -0.5, %v3619_v9  ;;  %v1261_v40 = vmul.f32 1.442695, %v1199_v62  ;;  %v5343_v60 = vmax.f32 %v3591_v13, 0.0  ;;  %v5348_v62 = vld [vmem:[#allocation16_spill] sm:$0xff] }
 0x124   :  { %v1720_v18 = vrot.slane %v1578_v6, %v3224_v7  ;;  %v1636_v31 = vrot.slane %v1557_v17, %v3224_v7  ;;  %v1289_v56 = vand.u32 2147483647, %v3600_v25  ;;  %v2946_v52 = vpop.eup %2945  ;;  %2949 = vpow2.f32 %v1263_v26 }
 0x125   :  { %v1558_v59 = vadd.f32 %v1318_v49, %v5343_v60  ;;  %v1298_v63 = vand.u32 2147483647, %v3619_v9  ;;  %v1355_v1 = vadd.f32 1.0, %v3913_v14  ;;  %v1285_v61 = vmul.f32 0.6931472, %v2946_v52 }
 0x126   :  { %v1757_v15 = vsel %vm1075_vm2, %v1720_v18, %v1716_v32  ;;  %v1358_v13 = vmul.f32 -0.5, %v3913_v14  ;;  %v1288_v44 = vmul.f32 %v3600_v25, %v1287_v46  ;;  %v1296_v35 = vadd.f32 1.0, %v1295_v2  ;;  %v5355_v18 = vld [vmem:[#allocation2_spill] sm:$0xff] }
 0x127   :  { %v1814_v43 = vsel %vm1777_vm3, %v1757_v15, 0.0  ;;  %v1640_v20 = vrot.slane %v1558_v59, %v3224_v7  ;;  %2951 = vlog2.f32 %v1355_v1  ;;  %v1364_v53 = vadd.f32 1.0, %v3823_v45  ;;  %v5356_v2 = vld [vmem:[#allocation10_spill] sm:$0xff]  ;;  %v5360_v1 = vld [vmem:[#allocation11_spill] sm:$0xff] }
 0x128   :  { %1815 = vadd.xlane.f32.xlu1 %v1814_v43  ;;  %vm4050_vm14 = vcmp.lt.f32.partialorder %v1289_v56, 0.0004427343  ;;  %v1361_v42 = vand.u32 2147483647, %v3913_v14  ;;  %v1367_v30 = vmul.f32 -0.5, %v3823_v45  ;;  %v1108_v21 = vmax.f32 %v3563_v24, 0.0 }
 0x129   :  { %v1747_v47 = vsel %vm1075_vm2, %v1640_v20, %v1636_v31  ;;  %v1291_v25 = vsel %vm4050_vm14, %v1288_v44, %v1285_v61  ;;  %2953 = vlog2.f32 %v1364_v53  ;;  %vm4060_vm15 = vcmp.lt.f32.partialorder %v1298_v63, 0.0004427343  ;;  %v5349_v24 = vld [vmem:[#allocation8_spill] sm:$0xff]  ;;  %v5357_v31 = vld [vmem:[#allocation3_spill] sm:$0xff] }
 0x12a   :  { %v1784_v22 = vsel %vm1777_vm3, %v1747_v47, 0.0  ;;  %2955 = vpow2.f32 %v1261_v40  ;;  %v1359_v50 = vadd.f32 1.0, %v1358_v13  ;;  %v1370_v41 = vand.u32 2147483647, %v3823_v45  ;;  %v5363_v53 = vld [vmem:[#allocation4_spill] sm:$0xff] }
 0x12b   :  { %1785 = vadd.xlane.f32.xlu0 %v1784_v22  ;;  %v1297_v36 = vmul.f32 %v3619_v9, %v1296_v35  ;;  %v1115_v26 = vmax.f32 %v3760_v54, 0.0  ;;  %v1116_v58 = vmax.f32 %v5348_v62, 0.0  ;;  %v1427_v11 = vadd.f32 1.0, %v5349_v24  ;;  %v2948_v27 = vpop.eup %2947 }
 0x12c   :  { %v1555_v10 = vadd.f32 %v1291_v25, %v1107_v5  ;;  %vm4071_vm0 = vcmp.lt.f32.partialorder %v1361_v42, 0.0004427343  ;;  %v1368_v6 = vadd.f32 1.0, %v1367_v30  ;;  %v1436_v51 = vadd.f32 1.0, %v5352_v28 }
 0x12d   :  { %v1294_v37 = vmul.f32 0.6931472, %v2948_v27  ;;  %2957 = vlog2.f32 %v1427_v11  ;;  %v1430_v9 = vmul.f32 -0.5, %v5349_v24  ;;  %v1433_v54 = vand.u32 2147483647, %v5349_v24  ;;  %v5364_v11 = vld [vmem:[#allocation5_spill] sm:$0xff] }
 0x12e   :  { %v1360_v32 = vmul.f32 %v3913_v14, %v1359_v50  ;;  %vm4079_vm1 = vcmp.lt.f32.partialorder %v1370_v41, 0.0004427343  ;;  %2959 = vlog2.f32 %v1436_v51  ;;  %v1439_v48 = vmul.f32 -0.5, %v5352_v28  ;;  %v4084_v5 = vpop.eup %2949 }
 0x12f   :  { %v1300_v17 = vsel %vm4060_vm15, %v1297_v36, %v1294_v37  ;;  %v1123_v49 = vmax.f32 %v5355_v18, 0.0  ;;  %v1442_v46 = vand.u32 2147483647, %v5352_v28  ;;  %v1445_v40 = vadd.f32 1.0, %v5356_v2 }
 0x130   :  { %v1556_v60 = vadd.f32 %v1300_v17, %v1108_v21  ;;  %v1628_v14 = vrot.slane %v1555_v10, %v3224_v7  ;;  %v1369_v59 = vmul.f32 %v3823_v45, %v1368_v6  ;;  %v1124_v56 = vmax.f32 %v5357_v31, 0.0 }
 0x131   :  { %v2952_v52 = vpop.eup %2951  ;;  %v1431_v15 = vadd.f32 1.0, %v1430_v9  ;;  %vm4094_vm4 = vcmp.lt.f32.partialorder %v1433_v54, 0.0004427343  ;;  %2961 = vlog2.f32 %v1445_v40  ;;  %v1454_v43 = vadd.f32 1.0, %v5360_v1 }
 0x132   :  { %v1632_v20 = vrot.slane %v1556_v60, %v3224_v7  ;;  %v1357_v61 = vmul.f32 0.6931472, %v2952_v52  ;;  %v1440_v13 = vadd.f32 1.0, %v1439_v48  ;;  %v1448_v44 = vmul.f32 -0.5, %v5356_v2 }
 0x133   :  { %v2954_v35 = vpop.eup %2953  ;;  %vm4101_vm5 = vcmp.lt.f32.partialorder %v1442_v46, 0.0004427343  ;;  %v1125_v47 = vmax.f32 %v5363_v53, 0.0  ;;  %v1451_v3 = vand.u32 2147483647, %v5356_v2  ;;  %2963 = vlog2.f32 %v1454_v43  ;;  %v5369_v46 = vld [vmem:[#allocation22_spill] sm:$0xff] }
 0x134   :  { %v4107_v42 = vpop.eup %2955  ;;  %v1746_v30 = vsel %vm1075_vm2, %v1632_v20, %v1628_v14  ;;  %v1363_v22 = vsel %vm4071_vm0, %v1360_v32, %v1357_v61  ;;  %v1366_v21 = vmul.f32 0.6931472, %v2954_v35  ;;  %v1457_v25 = vmul.f32 -0.5, %v5360_v1 }
 0x135   :  { %v1781_v55 = vsel %vm1777_vm3, %v1746_v30, 0.0  ;;  %v1563_v50 = vadd.f32 %v1363_v22, %v1115_v26  ;;  %v1432_v41 = vmul.f32 %v5349_v24, %v1431_v15  ;;  %v1460_v36 = vand.u32 2147483647, %v5360_v1 }
 0x136   :  { %1782 = vadd.xlane.f32.xlu1 %v1781_v55  ;;  %v1372_v62 = vsel %vm4079_vm1, %v1369_v59, %v1366_v21  ;;  %v1126_v27 = vmax.f32 %v5364_v11, 0.0  ;;  %v1449_v10 = vadd.f32 1.0, %v1448_v44  ;;  %v1373_v38 = vadd.f32 1.0, %v3939_v39  ;;  %v5370_v44 = vld [vmem:[#allocation21_spill] sm:$0xff] }
 0x137   :  { %v2958_v6 = vpop.eup %2957  ;;  %v1564_v51 = vadd.f32 %v1372_v62, %v1116_v58  ;;  %v1660_v37 = vrot.slane %v1563_v50, %v3224_v7  ;;  %v1441_v9 = vmul.f32 %v5352_v28, %v1440_v13  ;;  %v1382_v26 = vadd.f32 1.0, %v3934_v0 }
 0x138   :  { %v2960_v24 = vpop.eup %2959  ;;  %v1429_v54 = vmul.f32 0.6931472, %v2958_v6  ;;  %vm4123_vm6 = vcmp.lt.f32.partialorder %v1451_v3, 0.0004427343  ;;  %v1458_v8 = vadd.f32 1.0, %v1457_v25  ;;  %2965 = vlog2.f32 %v1373_v38  ;;  %v5373_v6 = vld [vmem:[#allocation20_spill] sm:$0xff] }
 0x139   :  { %v1664_v48 = vrot.slane %v1564_v51, %v3224_v7  ;;  %v1438_v17 = vmul.f32 0.6931472, %v2960_v24  ;;  %vm4128_vm7 = vcmp.lt.f32.partialorder %v1460_v36, 0.0004427343  ;;  %2967 = vlog2.f32 %v1382_v26 }
 0x13a   :  { %v1435_v58 = vsel %vm4094_vm4, %v1432_v41, %v1429_v54  ;;  %v1450_v28 = vmul.f32 %v5356_v2, %v1449_v10  ;;  %v1117_v40 = vmax.f32 %v5369_v46, 0.0  ;;  %v1376_v60 = vmul.f32 -0.5, %v3939_v39  ;;  %v5374_v54 = vld [vmem:[#allocation15_spill] sm:$0xff] }
 0x13b   :  { %v2962_v14 = vpop.eup %2961  ;;  %v1750_v59 = vsel %vm1075_vm2, %v1664_v48, %v1660_v37  ;;  %v1444_v31 = vsel %vm4101_vm5, %v1441_v9, %v1438_v17  ;;  %v1571_v52 = vadd.f32 %v1435_v58, %v1123_v49  ;;  %v1385_v15 = vmul.f32 -0.5, %v3934_v0  ;;  %v5375_v58 = vld [vmem:[#allocation19_spill] sm:$0xff] }
 0x13c   :  { %v1793_v43 = vsel %vm1777_vm3, %v1750_v59, 0.0  ;;  %v1572_v20 = vadd.f32 %v1444_v31, %v1124_v56  ;;  %v1447_v63 = vmul.f32 0.6931472, %v2962_v14  ;;  %v1459_v61 = vmul.f32 %v5360_v1, %v1458_v8 }
 0x13d   :  { %v2964_v2 = vpop.eup %2963  ;;  %1794 = vadd.xlane.f32.xlu0 %v1793_v43  ;;  %v1692_v13 = vrot.slane %v1571_v52, %v3224_v7  ;;  %v1118_v35 = vmax.f32 %v5370_v44, 0.0  ;;  %v1379_v53 = vand.u32 2147483647, %v3939_v39  ;;  %v1499_v45 = vadd.f32 1.0, %v3928_v19 }
 0x13e   :  { %v1696_v49 = vrot.slane %v1572_v20, %v3224_v7  ;;  %v1453_v3 = vsel %vm4123_vm6, %v1450_v28, %v1447_v63  ;;  %v1456_v30 = vmul.f32 0.6931472, %v2964_v2  ;;  %v1377_v56 = vadd.f32 1.0, %v1376_v60  ;;  %v5379_v2 = vld [vmem:[#allocation7_spill] sm:$0xff] }
 0x13f   :  { %v1573_v22 = vadd.f32 %v1453_v3, %v1125_v47  ;;  %v1386_v21 = vadd.f32 1.0, %v1385_v15  ;;  %2969 = vlog2.f32 %v1499_v45  ;;  %v1508_v1 = vadd.f32 1.0, %v3922_v57  ;;  %v5378_v15 = vld [vmem:[#allocation12_spill] sm:$0xff] }
 0x140   :  { %v1754_v25 = vsel %vm1075_vm2, %v1696_v49, %v1692_v13  ;;  %v1462_v55 = vsel %vm4128_vm7, %v1459_v61, %v1456_v30  ;;  %v1388_v50 = vand.u32 2147483647, %v3934_v0  ;;  %v1502_v41 = vmul.f32 -0.5, %v3928_v19 }
 0x141   :  { %v1805_v36 = vsel %vm1777_vm3, %v1754_v25, 0.0  ;;  %v1574_v62 = vadd.f32 %v1462_v55, %v1126_v27  ;;  %v1700_v11 = vrot.slane %v1573_v22, %v3224_v7  ;;  %vm4158_vm8 = vcmp.lt.f32.partialorder %v1379_v53, 0.0004427343  ;;  %v5380_v53 = vld [vmem:[#allocation6_spill] sm:$0xff]  ;;  %v265_v22 = vpop.xlane.xlu0 %264 }
 0x142   :  { %v2966_v10 = vpop.eup %2965  ;;  %1806 = vadd.xlane.f32.xlu1 %v1805_v36  ;;  %v1378_v38 = vmul.f32 %v3939_v39, %v1377_v56  ;;  %v1131_v51 = vmax.f32 %v5373_v6, 0.0  ;;  %v1505_v37 = vand.u32 2147483647, %v3928_v19  ;;  %2971 = vlog2.f32 %v1508_v1  ;;  %v5385_v6 = vld [vmem:[#allocation24_spill] sm:$0xff] }
 0x143   :  { %v2968_v9 = vpop.eup %2967  ;;  %v1704_v26 = vrot.slane %v1574_v62, %v3224_v7  ;;  %v1375_v24 = vmul.f32 0.6931472, %v2966_v10  ;;  %v1511_v27 = vmul.f32 -0.5, %v3922_v57  ;;  %v1319_v32 = vadd.f32 1.0, %v5374_v54 }
 0x144   :  { %v1384_v8 = vmul.f32 0.6931472, %v2968_v9  ;;  %v1387_v48 = vmul.f32 %v3934_v0, %v1386_v21  ;;  %vm1389_vm9 = vcmp.lt.f32.partialorder %v1388_v50, 0.0004427343  ;;  %v1503_v17 = vadd.f32 1.0, %v1502_v41 }
 0x145   :  { %v1755_v39 = vsel %vm1075_vm2, %v1704_v26, %v1700_v11  ;;  %v1381_v18 = vsel %vm4158_vm8, %v1378_v38, %v1375_v24  ;;  %v1132_v28 = vmax.f32 %v5375_v58, 0.0  ;;  %2973 = vlog2.f32 %v1319_v32 }
 0x146   :  { %v1808_v46 = vsel %vm1777_vm3, %v1755_v39, 0.0  ;;  %v1390_v60 = vsel %vm1389_vm9, %v1387_v48, %v1384_v8  ;;  %v1565_v14 = vadd.f32 %v1381_v18, %v1117_v40  ;;  %v1322_v59 = vmul.f32 -0.5, %v5374_v54  ;;  %v5388_v18 = vld [vmem:[#allocation23_spill] sm:$0xff] }
 0x147   :  { %1809 = vadd.xlane.f32.xlu1 %v1808_v46  ;;  %v1566_v31 = vadd.f32 %v1390_v60, %v1118_v35  ;;  %vm4175_vm10 = vcmp.lt.f32.partialorder %v1505_v37, 0.0004427343  ;;  %v1512_v52 = vadd.f32 1.0, %v1511_v27  ;;  %v1328_v43 = vadd.f32 1.0, %v5378_v15 }
 0x148   :  { %v1668_v20 = vrot.slane %v1565_v14, %v3224_v7  ;;  %v1504_v63 = vmul.f32 %v3928_v19, %v1503_v17  ;;  %v1514_v61 = vand.u32 2147483647, %v3922_v57  ;;  %v1111_v13 = vmax.f32 %v5379_v2, 0.0  ;;  %v4213_v17 = vpop.xlane.xlu0 %288 }
 0x149   :  { %v2970_v40 = vpop.eup %2969  ;;  %v1672_v44 = vrot.slane %v1566_v31, %v3224_v7  ;;  %v1112_v35 = vmax.f32 %v5380_v53, 0.0  ;;  %v1325_v45 = vand.u32 2147483647, %v5374_v54  ;;  %2975 = vlog2.f32 %v1328_v43  ;;  %v268_v31 = vpop.xlane.xlu1 %267  ;;  %v5395_v53 = vld [vmem:[#allocation17_spill] sm:$0xff] }
 0x14a   :  { %v1501_v49 = vmul.f32 0.6931472, %v2970_v40  ;;  %v1323_v3 = vadd.f32 1.0, %v1322_v59  ;;  %v1331_v30 = vmul.f32 -0.5, %v5378_v15  ;;  %v1517_v56 = vadd.f32 1.0, %v3948_v16 }
 0x14b   :  { %v1751_v19 = vsel %vm1075_vm2, %v1672_v44, %v1668_v20  ;;  %v1513_v21 = vmul.f32 %v3922_v57, %v1512_v52  ;;  %v1520_v1 = vmul.f32 -0.5, %v3948_v16  ;;  %v1526_v25 = vadd.f32 1.0, %v3944_v23 }
 0x14c   :  { %v2972_v55 = vpop.eup %2971  ;;  %v1796_v50 = vsel %vm1777_vm3, %v1751_v19, 0.0  ;;  %v1507_v41 = vsel %vm4175_vm10, %v1504_v63, %v1501_v49  ;;  %vm4196_vm11 = vcmp.lt.f32.partialorder %v1514_v61, 0.0004427343  ;;  %2977 = vlog2.f32 %v1517_v56 }
 0x14d   :  { %1797 = vadd.xlane.f32.xlu0 %v1796_v50  ;;  %v1510_v62 = vmul.f32 0.6931472, %v2972_v55  ;;  %v1579_v11 = vadd.f32 %v1507_v41, %v1131_v51  ;;  %v1334_v57 = vand.u32 2147483647, %v5378_v15  ;;  %2979 = vlog2.f32 %v1526_v25 }
 0x14e   :  { %v1324_v47 = vmul.f32 %v5374_v54, %v1323_v3  ;;  %vm4202_vm12 = vcmp.lt.f32.partialorder %v1325_v45, 0.0004427343  ;;  %v1332_v38 = vadd.f32 1.0, %v1331_v30  ;;  %v1133_v37 = vmax.f32 %v5385_v6, 0.0  ;;  %v5391_v45 = vld [vmem:[#allocation25_spill] sm:$0xff] }
 0x14f   :  { %v2974_v9 = vpop.eup %2973  ;;  %v1516_v26 = vsel %vm4196_vm11, %v1513_v21, %v1510_v62  ;;  %v1521_v24 = vadd.f32 1.0, %v1520_v1  ;;  %v1523_v27 = vand.u32 2147483647, %v3948_v16  ;;  %v1391_v51 = vadd.f32 1.0, %v4014_v4  ;;  %v4243_v21 = vpop.xlane.xlu0 %270  ;;  %v5394_v62 = vld [vmem:[#allocation18_spill] sm:$0xff] }
 0x150   :  { %v1580_v32 = vadd.f32 %v1516_v26, %v1132_v28  ;;  %v1724_v8 = vrot.slane %v1579_v11, %v3224_v7  ;;  %v1321_v54 = vmul.f32 0.6931472, %v2974_v9  ;;  %v1529_v48 = vmul.f32 -0.5, %v3944_v23 }
 0x151   :  { %vm4215_vm13 = vcmp.lt.f32.partialorder %v1334_v57, 0.0004427343  ;;  %v1134_v58 = vmax.f32 %v5388_v18, 0.0  ;;  %2981 = vlog2.f32 %v1391_v51  ;;  %v1400_v46 = vadd.f32 1.0, %v3987_v33  ;;  %v292_v57 = vpop.xlane.xlu1 %291 }
 0x152   :  { %v1728_v60 = vrot.slane %v1580_v32, %v3224_v7  ;;  %v1327_v28 = vsel %vm4202_vm12, %v1324_v47, %v1321_v54  ;;  %v1532_v14 = vand.u32 2147483647, %v3944_v23  ;;  %v1394_v59 = vmul.f32 -0.5, %v4014_v4 }
 0x153   :  { %v2976_v0 = vpop.eup %2975  ;;  %v1333_v52 = vmul.f32 %v5378_v15, %v1332_v38  ;;  %v1559_v43 = vadd.f32 %v1327_v28, %v1111_v13  ;;  %vm4227_vm14 = vcmp.lt.f32.partialorder %v1523_v27, 0.0004427343  ;;  %2983 = vlog2.f32 %v1400_v46 }
 0x154   :  { %v1758_v63 = vsel %vm1075_vm2, %v1728_v60, %v1724_v8  ;;  %v1330_v61 = vmul.f32 0.6931472, %v2976_v0  ;;  %v1522_v2 = vmul.f32 %v3948_v16, %v1521_v24  ;;  %v1530_v40 = vadd.f32 1.0, %v1529_v48  ;;  %v274_v48 = vpop.xlane.xlu0 %273 }
 0x155   :  { %v1817_v44 = vsel %vm1777_vm3, %v1758_v63, 0.0  ;;  %v1119_v49 = vmax.f32 %v5391_v45, 0.0  ;;  %v1403_v3 = vmul.f32 -0.5, %v3987_v33  ;;  %v2686_v30 = vmul.f32 -1.442695, %v265_v22 }
 0x156   :  { %v2978_v15 = vpop.eup %2977  ;;  %1818 = vadd.xlane.f32.xlu1 %v1817_v44  ;;  %v1336_v13 = vsel %vm4215_vm13, %v1333_v52, %v1330_v61  ;;  %vm4238_vm15 = vcmp.lt.f32.partialorder %v1532_v14, 0.0004427343  ;;  %v1120_v19 = vmax.f32 %v3855_v29, 0.0  ;;  %v1395_v16 = vadd.f32 1.0, %v1394_v59  ;;  %v295_v14 = vpop.xlane.xlu1 %294 }
 0x157   :  { %v2980_v1 = vpop.eup %2979  ;;  %v1560_v25 = vadd.f32 %v1336_v13, %v1112_v35  ;;  %v1644_v22 = vrot.slane %v1559_v43, %v3224_v7  ;;  %v1519_v55 = vmul.f32 0.6931472, %v2978_v15  ;;  %2985 = vpow2.f32 %v2686_v30  ;;  %v5396_v30 = vld [vmem:[#allocation14_spill] sm:$0xff]  ;;  %v5397_v13 = vld [vmem:[#allocation13_spill] sm:$0xff] }
 0x158   :  { %v1528_v50 = vmul.f32 0.6931472, %v2980_v1  ;;  %v1531_v41 = vmul.f32 %v3944_v23, %v1530_v40  ;;  %v1397_v36 = vand.u32 2147483647, %v4014_v4  ;;  %v1463_v11 = vadd.f32 1.0, %v5394_v62 }
 0x159   :  { %v1648_v29 = vrot.slane %v1560_v25, %v3224_v7  ;;  %v1525_v47 = vsel %vm4227_vm14, %v1522_v2, %v1519_v55  ;;  %v1404_v10 = vadd.f32 1.0, %v1403_v3  ;;  %v1472_v35 = vadd.f32 1.0, %v5395_v53 }
 0x15a   :  { %v1534_v38 = vsel %vm4238_vm15, %v1531_v41, %v1528_v50  ;;  %v1581_v6 = vadd.f32 %v1525_v47, %v1133_v37  ;;  %v1406_v9 = vand.u32 2147483647, %v3987_v33  ;;  %2987 = vlog2.f32 %v1463_v11 }
 0x15b   :  { %v2982_v23 = vpop.eup %2981  ;;  %v1748_v26 = vsel %vm1075_vm2, %v1648_v29, %v1644_v22  ;;  %v1582_v24 = vadd.f32 %v1534_v38, %v1134_v58  ;;  %v1396_v27 = vmul.f32 %v4014_v4, %v1395_v16  ;;  %2989 = vlog2.f32 %v1472_v35  ;;  %v298_v22 = vpop.xlane.xlu1 %297 }
 0x15c   :  { %v1787_v51 = vsel %vm1777_vm3, %v1748_v26, 0.0  ;;  %v1732_v32 = vrot.slane %v1581_v6, %v3224_v7  ;;  %v1393_v8 = vmul.f32 0.6931472, %v2982_v23  ;;  %v1466_v54 = vmul.f32 -0.5, %v5394_v62 }
 0x15d   :  { %v2984_v39 = vpop.eup %2983  ;;  %1788 = vadd.xlane.f32.xlu0 %v1787_v51  ;;  %v1736_v37 = vrot.slane %v1582_v24, %v3224_v7  ;;  %vm1398_vm0 = vcmp.lt.f32.partialorder %v1397_v36, 0.0004427343  ;;  %v1405_v18 = vmul.f32 %v3987_v33, %v1404_v10  ;;  %v2687_v46 = vmul.f32 -1.442695, %v268_v31 }
 0x15e   :  { %v1399_v58 = vsel %vm1398_vm0, %v1396_v27, %v1393_v8  ;;  %v1402_v60 = vmul.f32 0.6931472, %v2984_v39  ;;  %v1475_v4 = vmul.f32 -0.5, %v5395_v53  ;;  %v2694_v28 = vmul.f32 -1.442695, %v4213_v17 }
 0x15f   :  { %v1759_v59 = vsel %vm1075_vm2, %v1736_v37, %v1732_v32  ;;  %vm1407_vm1 = vcmp.lt.f32.partialorder %v1406_v9, 0.0004427343  ;;  %v1567_v0 = vadd.f32 %v1399_v58, %v1119_v49  ;;  %v1469_v52 = vand.u32 2147483647, %v5394_v62  ;;  %v277_v49 = vpop.xlane.xlu0 %276  ;;  %v301_v8 = vpop.xlane.xlu1 %300 }
 0x160   :  { %v1820_v43 = vsel %vm1777_vm3, %v1759_v59, 0.0  ;;  %v1408_v20 = vsel %vm1407_vm1, %v1405_v18, %v1402_v60  ;;  %v1467_v63 = vadd.f32 1.0, %v1466_v54  ;;  %2991 = vpow2.f32 %v2687_v46 }
 0x161   :  { %v2986_v33 = vpop.eup %2985  ;;  %1821 = vadd.xlane.f32.xlu1 %v1820_v43  ;;  %v1568_v31 = vadd.f32 %v1408_v20, %v1120_v19  ;;  %v1676_v61 = vrot.slane %v1567_v0, %v3224_v7  ;;  %2993 = vpow2.f32 %v2694_v28  ;;  %v1535_v17 = vadd.f32 1.0, %v4107_v42 }
 0x162   :  { %v488_v2 = vadd.f32 1.0, %v2986_v33  ;;  %v1476_v40 = vadd.f32 1.0, %v1475_v4  ;;  %v1478_v44 = vand.u32 2147483647, %v5395_v53  ;;  %v1544_v45 = vadd.f32 1.0, %v4084_v5 }
 0x163   :  { %v1680_v3 = vrot.slane %v1568_v31, %v3224_v7  ;;  %v1127_v15 = vmax.f32 %v5396_v30, 0.0  ;;  %v1128_v56 = vmax.f32 %v5397_v13, 0.0  ;;  %2995 = vlog2.f32 %v1535_v17  ;;  %v280_v23 = vpop.xlane.xlu0 %279  ;;  %v304_v17 = vpop.xlane.xlu1 %303 }
 0x164   :  { %v2988_v19 = vpop.eup %2987  ;;  %2997 = vrcp.f32 %v488_v2  ;;  %v1468_v16 = vmul.f32 %v5394_v62, %v1467_v63  ;;  %vm4278_vm4 = vcmp.lt.f32.partialorder %v1469_v52, 0.0004427343  ;;  %v2695_v25 = vmul.f32 -1.442695, %v292_v57 }
 0x165   :  { %v2990_v55 = vpop.eup %2989  ;;  %v1752_v50 = vsel %vm1075_vm2, %v1680_v3, %v1676_v61  ;;  %v1465_v41 = vmul.f32 0.6931472, %v2988_v19  ;;  %v1538_v36 = vmul.f32 -0.5, %v4107_v42  ;;  %2999 = vlog2.f32 %v1544_v45 }
 0x166   :  { %v1799_v11 = vsel %vm1777_vm3, %v1752_v50, 0.0  ;;  %v1474_v29 = vmul.f32 0.6931472, %v2990_v55  ;;  %v1477_v47 = vmul.f32 %v5395_v53, %v1476_v40  ;;  %vm1479_vm5 = vcmp.lt.f32.partialorder %v1478_v44, 0.0004427343 }
 0x167   :  { %1800 = vadd.xlane.f32.xlu0 %v1799_v11  ;;  %v1471_v62 = vsel %vm4278_vm4, %v1468_v16, %v1465_v41  ;;  %v1547_v57 = vmul.f32 -0.5, %v4084_v5  ;;  %3001 = vpow2.f32 %v2695_v25  ;;  %v2688_v10 = vmul.f32 -1.442695, %v4243_v21  ;;  %v283_v52 = vpop.xlane.xlu0 %282 }
 0x168   :  { %v1480_v35 = vsel %vm1479_vm5, %v1477_v47, %v1474_v29  ;;  %v1575_v38 = vadd.f32 %v1471_v62, %v1127_v15  ;;  %v2696_v6 = vmul.f32 -1.442695, %v295_v14  ;;  %v2689_v9 = vmul.f32 -1.442695, %v274_v48 }
 0x169   :  { %v1576_v26 = vadd.f32 %v1480_v35, %v1128_v56  ;;  %v1539_v24 = vadd.f32 1.0, %v1538_v36  ;;  %3003 = vpow2.f32 %v2688_v10  ;;  %v2697_v27 = vmul.f32 -1.442695, %v298_v22 }
 0x16a   :  { %v2992_v53 = vpop.eup %2991  ;;  %v1708_v51 = vrot.slane %v1575_v38, %v3224_v7  ;;  %v1135_v32 = vmax.f32 %v3964_v12, 0.0  ;;  %3005 = vpow2.f32 %v2696_v6  ;;  %v1541_v37 = vand.u32 2147483647, %v4107_v42 }
 0x16b   :  { %v2994_v54 = vpop.eup %2993  ;;  %v1712_v39 = vrot.slane %v1576_v26, %v3224_v7  ;;  %v489_v21 = vadd.f32 1.0, %v2992_v53  ;;  %3007 = vpow2.f32 %v2689_v9  ;;  %v1548_v18 = vadd.f32 1.0, %v1547_v57  ;;  %v286_v19 = vpop.xlane.xlu0 %285 }
 0x16c   :  { %v496_v48 = vadd.f32 1.0, %v2994_v54  ;;  %v1550_v46 = vand.u32 2147483647, %v4084_v5  ;;  %3009 = vpow2.f32 %v2697_v27  ;;  %v1540_v12 = vmul.f32 %v4107_v42, %v1539_v24  ;;  %v307_v24 = vpop.xlane.xlu1 %306 }
 0x16d   :  { %v2996_v58 = vpop.eup %2995  ;;  %v1756_v60 = vsel %vm1075_vm2, %v1712_v39, %v1708_v51  ;;  %3011 = vrcp.f32 %v489_v21  ;;  %v2690_v4 = vmul.f32 -1.442695, %v277_v49  ;;  %v2698_v0 = vmul.f32 -1.442695, %v301_v8 }
 0x16e   :  { %v4297_v28 = vpop.eup %2997  ;;  %v1811_v14 = vsel %vm1777_vm3, %v1756_v60, 0.0  ;;  %3013 = vrcp.f32 %v496_v48  ;;  %v1537_v59 = vmul.f32 0.6931472, %v2996_v58  ;;  %v1136_v63 = vmax.f32 %v3958_v34, 0.0 }
 0x16f   :  { %v3000_v43 = vpop.eup %2999  ;;  %v737_v20 = vsub.f32 0.0, %v4297_v28  ;;  %1812 = vadd.xlane.f32.xlu1 %v1811_v14  ;;  %vm1542_vm6 = vcmp.lt.f32.partialorder %v1541_v37, 0.0004427343  ;;  %v2691_v33 = vmul.f32 -1.442695, %v280_v23  ;;  %v1549_v42 = vmul.f32 %v4084_v5, %v1548_v18  ;;  %v2130_v62 = vpop.xlane.xlu0 %2129 }
 0x170   :  { %v1543_v31 = vsel %vm1542_vm6, %v1540_v12, %v1537_v59  ;;  %v1546_v61 = vmul.f32 0.6931472, %v3000_v43  ;;  %vm1551_vm7 = vcmp.lt.f32.partialorder %v1550_v46, 0.0004427343  ;;  %3015 = vpow2.f32 %v2690_v4 }
 0x171   :  { %v3002_v2 = vpop.eup %3001  ;;  %v769_v40 = vand.u32 2147483647, %v737_v20  ;;  %v1583_v44 = vadd.f32 %v1543_v31, %v1135_v32  ;;  %v2699_v45 = vmul.f32 -1.442695, %v304_v17  ;;  %3017 = vpow2.f32 %v2698_v0  ;;  %v310_v31 = vpop.xlane.xlu1 %309 }
 0x172   :  { %v1552_v49 = vsel %vm1551_vm7, %v1549_v42, %v1546_v61  ;;  %v497_v3 = vadd.f32 1.0, %v3002_v2  ;;  %3019 = vpow2.f32 %v2691_v33  ;;  %v2692_v10 = vmul.f32 -1.442695, %v283_v52 }
 0x173   :  { %v3004_v30 = vpop.eup %3003  ;;  %v785_v34 = vsub.f32 0.0, %v769_v40  ;;  %v1584_v15 = vadd.f32 %v1552_v49, %v1136_v63  ;;  %v1740_v13 = vrot.slane %v1583_v44, %v3224_v7  ;;  %v2700_v53 = vmul.f32 -1.442695, %v307_v24  ;;  %v2154_v39 = vpop.xlane.xlu0 %2153 }
 0x174   :  { %v3006_v56 = vpop.eup %3005  ;;  %3021 = vrcp.f32 %v497_v3  ;;  %v490_v5 = vadd.f32 1.0, %v3004_v30  ;;  %v4319_v51 = vmul.f32 0.33333334, %v2130_v62  ;;  %v2693_v48 = vmul.f32 -1.442695, %v286_v19 }
 0x175   :  { %v3008_v16 = vpop.eup %3007  ;;  %v801_v1 = vmul.f32 1.442695, %v785_v34  ;;  %v1744_v25 = vrot.slane %v1584_v15, %v3224_v7  ;;  %v498_v22 = vadd.f32 1.0, %v3006_v56  ;;  %3023 = vpow2.f32 %v2699_v45 }
 0x176   :  { %v3010_v55 = vpop.eup %3009  ;;  %3025 = vrcp.f32 %v490_v5  ;;  %v491_v36 = vadd.f32 1.0, %v3008_v16  ;;  %v2346_v12 = vand.u32 2147483647, %v4319_v51  ;;  %v4329_v4 = vmul.f32 0.33333334, %v2154_v39 }
 0x177   :  { %v4307_v50 = vpop.eup %3011  ;;  %3027 = vpow2.f32 %v801_v1  ;;  %v1760_v41 = vsel %vm1075_vm2, %v1744_v25, %v1740_v13  ;;  %v499_v38 = vadd.f32 1.0, %v3010_v55  ;;  %v2212_v49 = vrot.slane %v4297_v28, %v3224_v7 }
 0x178   :  { %v4310_v11 = vpop.eup %3013  ;;  %v738_v29 = vsub.f32 0.0, %v4307_v50  ;;  %v1823_v47 = vsel %vm1777_vm3, %v1760_v41, 0.0  ;;  %3029 = vrcp.f32 %v498_v22  ;;  %v2354_v17 = vand.u32 2147483647, %v4329_v4 }
 0x179   :  { %v745_v57 = vsub.f32 0.0, %v4310_v11  ;;  %1824 = vadd.xlane.f32.xlu1 %v1823_v47  ;;  %3031 = vrcp.f32 %v491_v36  ;;  %v2362_v44 = vsub.f32 0.0, %v2346_v12  ;;  %v4341_v3 = vmul.f32 -1.442695, %v310_v31 }
 0x17a   :  { %v770_v35 = vand.u32 2147483647, %v738_v29  ;;  %v3016_v6 = vpop.eup %3015  ;;  %3033 = vpow2.f32 %v2692_v10  ;;  %v2330_v13 = vmax.f32 %v4319_v51, 0.0  ;;  %v4351_v56 = vmax.f32 %v737_v20, 0.0 }
 0x17b   :  { %v777_v9 = vand.u32 2147483647, %v745_v57  ;;  %v3018_v23 = vpop.eup %3017  ;;  %3035 = vrcp.f32 %v499_v38  ;;  %v492_v54 = vadd.f32 1.0, %v3016_v6  ;;  %v2370_v19 = vsub.f32 0.0, %v2354_v17 }
 0x17c   :  { %v786_v26 = vsub.f32 0.0, %v770_v35  ;;  %v3020_v27 = vpop.eup %3019  ;;  %v500_v60 = vadd.f32 1.0, %v3018_v23  ;;  %3037 = vpow2.f32 %v2700_v53  ;;  %v4354_v25 = vmul.f32 1.442695, %v2362_v44 }
 0x17d   :  { %v793_v8 = vsub.f32 0.0, %v777_v9  ;;  %3039 = vrcp.f32 %v492_v54  ;;  %v493_v43 = vadd.f32 1.0, %v3020_v27  ;;  %v2338_v22 = vmax.f32 %v4329_v4, 0.0 }
 0x17e   :  { %v4321_v32 = vpop.eup %3021  ;;  %v803_v46 = vmul.f32 1.442695, %v786_v26  ;;  %3041 = vpow2.f32 %v2693_v48  ;;  %v2216_v41 = vrot.slane %v4307_v50, %v3224_v7  ;;  %v2244_v36 = vrot.slane %v4310_v11, %v3224_v7 }
 0x17f   :  { %v3024_v21 = vpop.eup %3023  ;;  %v746_v37 = vsub.f32 0.0, %v4321_v32  ;;  %v817_v59 = vmul.f32 1.442695, %v793_v8  ;;  %v4367_v35 = vmax.f32 %v738_v29, 0.0  ;;  %v4371_v26 = vmax.f32 %v745_v57, 0.0 }
 0x180   :  { %v4324_v18 = vpop.eup %3025  ;;  %3043 = vpow2.f32 %v803_v46  ;;  %v501_v33 = vadd.f32 1.0, %v3024_v21  ;;  %v2248_v24 = vrot.slane %v4321_v32, %v3224_v7  ;;  %v4375_v27 = vmul.f32 1.442695, %v2370_v19 }
 0x181   :  { %v4326_v58 = vpop.eup %3027  ;;  %v778_v0 = vand.u32 2147483647, %v746_v37  ;;  %v739_v52 = vsub.f32 0.0, %v4324_v18  ;;  %3045 = vrcp.f32 %v500_v60  ;;  %v4379_v8 = vmax.f32 %v746_v37, 0.0 }
 0x182   :  { %v4331_v14 = vpop.eup %3029  ;;  %v833_v42 = vadd.f32 1.0, %v4326_v58  ;;  %3047 = vpow2.f32 %v817_v59  ;;  %v836_v5 = vmul.f32 -0.5, %v4326_v58  ;;  %v839_v10 = vand.u32 2147483647, %v4326_v58 }
 0x183   :  { %v747_v63 = vsub.f32 0.0, %v4331_v14  ;;  %v4335_v61 = vpop.eup %3031  ;;  %v794_v2 = vsub.f32 0.0, %v778_v0  ;;  %v771_v40 = vand.u32 2147483647, %v739_v52  ;;  %3049 = vrcp.f32 %v493_v43 }
 0x184   :  { %v3034_v45 = vpop.eup %3033  ;;  %v740_v15 = vsub.f32 0.0, %v4335_v61  ;;  %3051 = vrcp.f32 %v501_v33  ;;  %v837_v23 = vadd.f32 1.0, %v836_v5  ;;  %vm1077_vm3 = vcmask 1042434  }
 0x185   :  { %v4343_v30 = vpop.eup %3035  ;;  %v779_v34 = vand.u32 2147483647, %v747_v63  ;;  %3053 = vlog2.f32 %v833_v42  ;;  %v819_v16 = vmul.f32 1.442695, %v794_v2  ;;  %v787_v1 = vsub.f32 0.0, %v771_v40 }
 0x186   :  { %v3038_v55 = vpop.eup %3037  ;;  %v748_v20 = vsub.f32 0.0, %v4343_v30  ;;  %v494_v47 = vadd.f32 1.0, %v3034_v45  ;;  %v772_v6 = vand.u32 2147483647, %v740_v15  ;;  %v2220_v57 = vrot.slane %v4324_v18, %v3224_v7 }
 0x187   :  { %v4362_v62 = vpop.eup %3039  ;;  %v795_v38 = vsub.f32 0.0, %v779_v34  ;;  %3055 = vpow2.f32 %v819_v16  ;;  %v805_v29 = vmul.f32 1.442695, %v787_v1  ;;  %v4381_v54 = vadd.f32 1.0, %v3038_v55 }
 0x188   :  { %v3042_v9 = vpop.eup %3041  ;;  %v780_v21 = vand.u32 2147483647, %v748_v20  ;;  %v741_v48 = vsub.f32 0.0, %v4362_v62  ;;  %3057 = vrcp.f32 %v494_v47  ;;  %vm1079_vm8 = vcmask 1043459  }
 0x189   :  { %vm4390_vm9 = vcmp.lt.f32.partialorder %v839_v10, 0.0004427343  ;;  %v4394_v60 = vmax.f32 %v739_v52, 0.0  ;;  %v821_v12 = vmul.f32 1.442695, %v795_v38  ;;  %v788_v59 = vsub.f32 0.0, %v772_v6  ;;  %v2142_v10 = vpop.xlane.xlu0 %2141 }
 0x18a   :  { %v4377_v53 = vpop.eup %3043  ;;  %vm1081_vm10 = vcmask 1044484   ;;  %v4399_v18 = vmul.f32 %v4326_v58, %v837_v23  ;;  %v4404_v33 = vmax.f32 %v747_v63, 0.0  ;;  %v2252_v31 = vrot.slane %v4331_v14, %v3224_v7 }
 0x18b   :  { %v4383_v39 = vpop.eup %3045  ;;  %v842_v43 = vadd.f32 1.0, %v4377_v53  ;;  %v845_v52 = vmul.f32 -0.5, %v4377_v53  ;;  %3059 = vpow2.f32 %v805_v29  ;;  %v4411_v17 = vmax.f32 %v740_v15, 0.0 }
 0x18c   :  { %v4388_v46 = vpop.eup %3047  ;;  %5402 = vst [vmem:[#allocation16_spill] sm:$0xff] %v4404_v33  ;;  %v4413_v2 = vmax.f32 %v748_v20, 0.0  ;;  %vm1083_vm11 = vcmask 1045509   ;;  %v796_v44 = vsub.f32 0.0, %v780_v21  ;;  %v773_v63 = vand.u32 2147483647, %v741_v48 }
 0x18d   :  { %v4396_v0 = vpop.eup %3049  ;;  %v905_v40 = vadd.f32 1.0, %v4388_v46  ;;  %v5281_v45 = vsub.f32 0.0, %v4383_v39  ;;  %v908_v34 = vmul.f32 -0.5, %v4388_v46  ;;  %3061 = vpow2.f32 %v821_v12  ;;  %v2166_v12 = vpop.xlane.xlu1 %2165 }
 0x18e   :  { %v4408_v42 = vpop.eup %3051  ;;  %5403 = vst [vmem:[#allocation8_spill] sm:$0xff] %v4413_v2  ;;  %v807_v5 = vmul.f32 1.442695, %v788_v59  ;;  %v495_v19 = vadd.f32 1.0, %v3042_v9  ;;  %3063 = vlog2.f32 %v842_v43  ;;  %v848_v15 = vand.u32 2147483647, %v4377_v53 }
 0x18f   :  { %v3054_v58 = vpop.eup %3053  ;;  %v742_v16 = vsub.f32 0.0, %v4396_v0  ;;  %v5280_v1 = vsub.f32 0.0, %v4408_v42  ;;  %vm1085_vm12 = vcmask 1046534   ;;  %v846_v20 = vadd.f32 1.0, %v845_v52 }
 0x190   :  { %v835_v55 = vmul.f32 0.6931472, %v3054_v58  ;;  %3065 = vrcp.f32 %v495_v19  ;;  %v2224_v47 = vrot.slane %v4335_v61, %v3224_v7  ;;  %v823_v38 = vmul.f32 1.442695, %v796_v44 }
 0x191   :  { %3067 = vlog2.f32 %v905_v40  ;;  %v781_v6 = vand.u32 2147483647, %v5281_v45  ;;  %v2228_v9 = vrot.slane %v4362_v62, %v3224_v7  ;;  %v4429_v23 = vpop.eup %3055  ;;  %v909_v29 = vadd.f32 1.0, %v908_v34 }
 0x192   :  { %3069 = vpow2.f32 %v807_v5  ;;  %v789_v21 = vsub.f32 0.0, %v773_v63  ;;  %v2273_v61 = vsel %vm1075_vm2, %v2216_v41, %v2212_v49  ;;  %v4438_v59 = vpop.eup %3057  ;;  %v911_v43 = vand.u32 2147483647, %v4388_v46 }
 0x193   :  { %3071 = vpow2.f32 %v4341_v3  ;;  %v2232_v52 = vrot.slane %v4396_v0, %v3224_v7  ;;  %v2274_v58 = vsel %vm1077_vm3, %v2220_v57, %v2273_v61  ;;  %v841_v28 = vsel %vm4390_vm9, %v4399_v18, %v835_v55 }
 0x194   :  { %v4449_v50 = vmul.f32 %v4377_v53, %v846_v20  ;;  %3073 = vpow2.f32 %v4354_v25  ;;  %v2275_v49 = vsel %vm1079_vm8, %v2224_v47, %v2274_v58  ;;  %v914_v41 = vadd.f32 1.0, %v4429_v23  ;;  %v2136_v25 = vpop.xlane.xlu0 %2135  ;;  %v2133_v47 = vpop.xlane.xlu1 %2132 }
 0x195   :  { %v797_v40 = vsub.f32 0.0, %v781_v6  ;;  %3075 = vpow2.f32 %v4375_v27  ;;  %v2276_v3 = vsel %vm1081_vm10, %v2228_v9, %v2275_v49  ;;  %v4456_v44 = vpop.eup %3059  ;;  %v4459_v57 = vmul.f32 %v4388_v46, %v909_v29 }
 0x196   :  { %3077 = vpow2.f32 %v823_v38  ;;  %v809_v37 = vmul.f32 1.442695, %v789_v21  ;;  %v2236_v18 = vrot.slane %v4438_v59, %v3224_v7  ;;  %v774_v63 = vand.u32 2147483647, %v742_v16 }
 0x197   :  { %v2277_v34 = vsel %vm1083_vm11, %v2232_v52, %v2276_v3  ;;  %v4466_v5 = vmul.f32 0.33333334, %v2142_v10  ;;  %v4468_v27 = vmul.f32 0.33333334, %v2166_v12  ;;  %v4470_v19 = vpop.eup %3061  ;;  %v4473_v46 = vadd.f32 %v841_v28, %v4351_v56 }
 0x198   :  { %v917_v55 = vmul.f32 -0.5, %v4429_v23  ;;  %v4478_v20 = vand.u32 2147483647, %v5280_v1  ;;  %3079 = vrcp.f32 %v4381_v54  ;;  %v3064_v38 = vpop.eup %3063  ;;  %v825_v10 = vmul.f32 1.442695, %v797_v40 }
 0x199   :  { %3081 = vlog2.f32 %v914_v41  ;;  %v2350_v6 = vand.u32 2147483647, %v4466_v5  ;;  %v4482_v9 = vmul.f32 0.33333334, %v2136_v25  ;;  %vm1087_vm13 = vcmask 1047559   ;;  %v2145_v41 = vpop.xlane.xlu0 %2144 }
 0x19a   :  { %v4484_v29 = vpop.eup %3065  ;;  %v2278_v56 = vsel %vm1085_vm12, %v2236_v18, %v2277_v34  ;;  %v2280_v54 = vsel %vm1075_vm2, %v2248_v24, %v2244_v36  ;;  %v2358_v21 = vand.u32 2147483647, %v4468_v27  ;;  %vm1098_vm14 = vcmask 31744  }
 0x19b   :  { %v3068_v61 = vpop.eup %3067  ;;  %v2240_v12 = vrot.slane %v4484_v29, %v3224_v7  ;;  %v2366_v52 = vsub.f32 0.0, %v2350_v6  ;;  %v4497_v58 = vmul.f32 0.33333334, %v2133_v47  ;;  %vm4503_vm15 = vcmp.lt.f32.partialorder %v848_v15, 0.0004427343 }
 0x19c   :  { %v4499_v28 = vpop.eup %3069  ;;  %vm4507_vm0 = vcmp.lt.f32.partialorder %v911_v43, 0.0004427343  ;;  %v920_v36 = vand.u32 2147483647, %v4429_v23  ;;  %3083 = vpow2.f32 %v809_v37  ;;  %v790_v24 = vsub.f32 0.0, %v774_v63 }
 0x19d   :  { %v798_v49 = vsub.f32 0.0, %v4478_v20  ;;  %v3072_v40 = vpop.eup %3071  ;;  %v2279_v3 = vsel %vm1087_vm13, %v2240_v12, %v2278_v56  ;;  %v2256_v53 = vrot.slane %v4343_v30, %v3224_v7  ;;  %v2281_v15 = vsel %vm1077_vm3, %v2252_v31, %v2280_v54  ;;  %v2157_v12 = vpop.xlane.xlu1 %2156 }
 0x19e   :  { %v2348_v43 = vand.u32 2147483647, %v4482_v9  ;;  %v4521_v18 = vpop.eup %3073  ;;  %v503_v37 = vadd.f32 1.0, %v3072_v40  ;;  %v2289_v25 = vsel %vm1098_vm14, %v2279_v3, 0.0  ;;  %v2386_v63 = vmul.f32 1.442695, %v2366_v52 }
 0x19f   :  { %v2374_v34 = vsub.f32 0.0, %v2358_v21  ;;  %v4524_v20 = vpop.eup %3075  ;;  %3085 = vpow2.f32 %v825_v10  ;;  %v2410_v47 = vadd.f32 1.0, %v4521_v18  ;;  %2290 = vadd.xlane.f32.xlu0 %v2289_v25  ;;  %v2347_v30 = vand.u32 2147483647, %v4497_v58 }
 0x1a0   :  { %v4528_v14 = vmul.f32 0.33333334, %v2145_v41  ;;  %v4530_v31 = vpop.eup %3077  ;;  %v918_v6 = vadd.f32 1.0, %v917_v55  ;;  %v811_v56 = vmul.f32 1.442695, %v790_v24  ;;  %3087 = vrcp.f32 %v503_v37 }
 0x1a1   :  { %v2260_v54 = vrot.slane %v4383_v39, %v3224_v7  ;;  %v844_v21 = vmul.f32 0.6931472, %v3064_v38  ;;  %v2482_v52 = vadd.f32 1.0, %v4524_v20  ;;  %v2282_v10 = vsel %vm1079_vm8, %v2256_v53, %v2281_v15 }
 0x1a2   :  { %v2364_v40 = vsub.f32 0.0, %v2348_v43  ;;  %v4536_v3 = vpop.eup %3079  ;;  %v907_v25 = vmul.f32 0.6931472, %v3068_v61  ;;  %v2264_v41 = vrot.slane %v4408_v42, %v3224_v7  ;;  %3089 = vpow2.f32 %v2386_v63 }
 0x1a3   :  { %v2402_v55 = vmul.f32 1.442695, %v2374_v34  ;;  %v3082_v24 = vpop.eup %3081  ;;  %3091 = vlog2.f32 %v2410_v47  ;;  %v2363_v37 = vsub.f32 0.0, %v2347_v30  ;;  %v2351_v1 = vand.u32 2147483647, %v4528_v14 }
 0x1a4   :  { %v4541_v45 = vmul.f32 0.33333334, %v2157_v12  ;;  %3093 = vpow2.f32 %v811_v56  ;;  %v827_v38 = vmul.f32 1.442695, %v798_v49  ;;  %v2283_v53 = vsel %vm1081_vm10, %v2260_v54, %v2282_v10 }
 0x1a5   :  { %v743_v15 = vsub.f32 0.0, %v4438_v59  ;;  %vm4545_vm1 = vcmp.lt.f32.partialorder %v920_v36, 0.0004427343  ;;  %3095 = vlog2.f32 %v2482_v52  ;;  %v2382_v43 = vmul.f32 1.442695, %v2364_v40 }
 0x1a6   :  { %5408 = vst [vmem:[#allocation9_spill] sm:$0xff] %v4541_v45  ;;  %v2367_v63 = vsub.f32 0.0, %v2351_v1  ;;  %v4549_v34 = vpop.eup %3083  ;;  %v919_v47 = vmul.f32 %v4429_v23, %v918_v6  ;;  %v2268_v30 = vrot.slane %v4536_v3, %v3224_v7  ;;  %3097 = vpow2.f32 %v2402_v55 }
 0x1a7   :  { %v2355_v49 = vand.u32 2147483647, %v4541_v45  ;;  %v850_v36 = vsel %vm4503_vm15, %v4449_v50, %v844_v21  ;;  %v913_v56 = vsel %vm4507_vm0, %v4459_v57, %v907_v25  ;;  %v2284_v1 = vsel %vm1083_vm11, %v2264_v41, %v2283_v53 }
 0x1a8   :  { %v2380_v54 = vmul.f32 1.442695, %v2363_v37  ;;  %v916_v12 = vmul.f32 0.6931472, %v3082_v24  ;;  %3099 = vpow2.f32 %v827_v38  ;;  %v744_v23 = vsub.f32 0.0, %v4484_v29 }
 0x1a9   :  { %v775_v6 = vand.u32 2147483647, %v743_v15  ;;  %v4565_v52 = vpop.eup %3085  ;;  %v2413_v10 = vmul.f32 -0.5, %v4521_v18  ;;  %v2485_v50 = vmul.f32 -0.5, %v4524_v20  ;;  %3101 = vpow2.f32 %v2382_v43 }
 0x1aa   :  { %v2388_v11 = vmul.f32 1.442695, %v2367_v63  ;;  %v4569_v32 = vpop.eup %3087  ;;  %v4572_v57 = vadd.f32 %v850_v36, %v4367_v35  ;;  %v4575_v21 = vadd.f32 %v913_v56, %v4371_v26  ;;  %v2285_v29 = vsel %vm1085_vm12, %v2268_v30, %v2284_v1 }
 0x1ab   :  { %v2371_v40 = vsub.f32 0.0, %v2355_v49  ;;  %v2416_v25 = vand.u32 2147483647, %v4521_v18  ;;  %v2272_v41 = vrot.slane %v4569_v32, %v3224_v7  ;;  %3103 = vpow2.f32 %v2380_v54 }
 0x1ac   :  { %5411 = vst [vmem:[#allocation2_spill] sm:$0xff] %v4575_v21  ;;  %v4582_v24 = vpop.eup %3089  ;;  %v922_v35 = vsel %vm4545_vm1, %v919_v47, %v916_v12  ;;  %v2488_v37 = vand.u32 2147483647, %v4524_v20  ;;  %v776_v26 = vand.u32 2147483647, %v744_v23  ;;  %v791_v38 = vsub.f32 0.0, %v775_v6 }
 0x1ad   :  { %v3092_v53 = vpop.eup %3091  ;;  %v2414_v43 = vadd.f32 1.0, %v2413_v10  ;;  %v2486_v63 = vadd.f32 1.0, %v2485_v50  ;;  %v2286_v30 = vsel %vm1087_vm13, %v2272_v41, %v2285_v29  ;;  %3105 = vpow2.f32 %v2388_v11 }
 0x1ae   :  { %v4588_v49 = vpop.eup %3093  ;;  %v2292_v36 = vsel %vm1098_vm14, %v2286_v30, 0.0  ;;  %v2396_v61 = vmul.f32 1.442695, %v2371_v40  ;;  %v4594_v54 = vadd.f32 %v922_v35, %v4379_v8  ;;  %v2446_v12 = vadd.f32 1.0, %v4582_v24 }
 0x1af   :  { %v3096_v47 = vpop.eup %3095  ;;  %2293 = vadd.xlane.f32.xlu1 %v2292_v36  ;;  %v2412_v11 = vmul.f32 0.6931472, %v3092_v53  ;;  %v2449_v29 = vmul.f32 -0.5, %v4582_v24  ;;  %v792_v41 = vsub.f32 0.0, %v776_v26  ;;  %v813_v30 = vmul.f32 1.442695, %v791_v38 }
 0x1b0   :  { %5412 = vst [vmem:[#allocation10_spill] sm:$0xff] %v4594_v54  ;;  %v4599_v50 = vpop.eup %3097  ;;  %v2415_v40 = vmul.f32 %v4521_v18, %v2414_v43  ;;  %vm4603_vm4 = vcmp.lt.f32.partialorder %v2416_v25, 0.0004427343  ;;  %v2487_v8 = vmul.f32 %v4524_v20, %v2486_v63  ;;  %vm4608_vm5 = vcmp.lt.f32.partialorder %v2488_v37, 0.0004427343 }
 0x1b1   :  { %v2484_v10 = vmul.f32 0.6931472, %v3096_v47  ;;  %3107 = vpow2.f32 %v2396_v61  ;;  %v4617_v26 = vmax.f32 %v741_v48, 0.0  ;;  %v2518_v25 = vadd.f32 1.0, %v4599_v50 }
 0x1b2   :  { %v4612_v36 = vpop.eup %3099  ;;  %3109 = vlog2.f32 %v2446_v12  ;;  %v4624_v20 = vmax.f32 %v742_v16, 0.0  ;;  %v854_v37 = vmul.f32 -0.5, %v4456_v44  ;;  %v2418_v38 = vsel %vm4603_vm4, %v2415_v40, %v2412_v11 }
 0x1b3   :  { %v4619_v18 = vpop.eup %3101  ;;  %v2450_v43 = vadd.f32 1.0, %v2449_v29  ;;  %3111 = vpow2.f32 %v813_v30  ;;  %v815_v63 = vmul.f32 1.442695, %v792_v41  ;;  %v2521_v48 = vmul.f32 -0.5, %v4599_v50 }
 0x1b4   :  { %v4634_v61 = vmax.f32 %v743_v15, 0.0  ;;  %v4636_v47 = vmax.f32 %v744_v23, 0.0  ;;  %v851_v0 = vadd.f32 1.0, %v4456_v44  ;;  %v2490_v16 = vsel %vm4608_vm5, %v2487_v8, %v2484_v10 }
 0x1b5   :  { %v4629_v62 = vpop.eup %3103  ;;  %v2431_v56 = vmul.f32 -0.5, %v4619_v18  ;;  %v857_v12 = vand.u32 2147483647, %v4456_v44  ;;  %v860_v11 = vadd.f32 1.0, %v4499_v28  ;;  %v4648_v59 = vadd.f32 %v2418_v38, %v2330_v13  ;;  %v2160_v13 = vpop.xlane.xlu1 %2159 }
 0x1b6   :  { %v2452_v15 = vand.u32 2147483647, %v4582_v24  ;;  %3113 = vlog2.f32 %v2518_v25  ;;  %v2428_v23 = vadd.f32 1.0, %v4619_v18  ;;  %v4653_v41 = vmul.f32 %v4582_v24, %v2450_v43 }
 0x1b7   :  { %v4644_v29 = vpop.eup %3105  ;;  %5417 = vst [vmem:[#allocation3_spill] sm:$0xff] %v4648_v59  ;;  %v2419_v10 = vadd.f32 1.0, %v4629_v62  ;;  %3115 = vpow2.f32 %v815_v63  ;;  %v855_v30 = vadd.f32 1.0, %v854_v37  ;;  %v4658_v40 = vadd.f32 %v2490_v16, %v2338_v22 }
 0x1b8   :  { %v2522_v8 = vadd.f32 1.0, %v2521_v48  ;;  %v2422_v51 = vmul.f32 -0.5, %v4629_v62  ;;  %3117 = vlog2.f32 %v851_v0  ;;  %v2432_v35 = vadd.f32 1.0, %v2431_v56 }
 0x1b9   :  { %5418 = vst [vmem:[#allocation11_spill] sm:$0xff] %v4658_v40  ;;  %v2455_v25 = vadd.f32 1.0, %v4644_v29  ;;  %3119 = vlog2.f32 %v860_v11  ;;  %v863_v37 = vmul.f32 -0.5, %v4499_v28  ;;  %v869_v4 = vadd.f32 1.0, %v4549_v34  ;;  %v4737_v24 = vpop.xlane.xlu1 %2168 }
 0x1ba   :  { %3121 = vlog2.f32 %v2428_v23  ;;  %v2458_v43 = vmul.f32 -0.5, %v4644_v29  ;;  %v878_v63 = vadd.f32 1.0, %v4588_v49  ;;  %v4675_v16 = vmul.f32 %v4599_v50, %v2522_v8 }
 0x1bb   :  { %v4667_v22 = vpop.eup %3107  ;;  %3123 = vlog2.f32 %v2419_v10  ;;  %v2423_v56 = vadd.f32 1.0, %v2422_v51  ;;  %vm4679_vm6 = vcmp.lt.f32.partialorder %v2452_v15, 0.0004427343  ;;  %v4684_v10 = vmul.f32 %v4619_v18, %v2432_v35 }
 0x1bc   :  { %v3110_v48 = vpop.eup %3109  ;;  %3125 = vlog2.f32 %v869_v4  ;;  %v872_v53 = vmul.f32 -0.5, %v4549_v34  ;;  %v864_v8 = vadd.f32 1.0, %v863_v37  ;;  %v866_v51 = vand.u32 2147483647, %v4499_v28 }
 0x1bd   :  { %v4677_v11 = vpop.eup %3111  ;;  %3127 = vlog2.f32 %v2455_v25  ;;  %v2459_v4 = vadd.f32 1.0, %v2458_v43  ;;  %v2491_v15 = vadd.f32 1.0, %v4667_v22  ;;  %v2494_v6 = vmul.f32 -0.5, %v4667_v22 }
 0x1be   :  { %3129 = vlog2.f32 %v878_v63  ;;  %v881_v1 = vmul.f32 -0.5, %v4588_v49  ;;  %v4695_v55 = vmul.f32 0.6931472, %v3110_v48  ;;  %v4698_v25 = vmul.f32 %v4629_v62, %v2423_v56 }
 0x1bf   :  { %v887_v37 = vadd.f32 1.0, %v4677_v11  ;;  %v856_v43 = vmul.f32 %v4456_v44, %v855_v30  ;;  %vm4705_vm7 = vcmp.lt.f32.partialorder %v857_v12, 0.0004427343  ;;  %v873_v38 = vadd.f32 1.0, %v872_v53 }
 0x1c0   :  { %v4693_v35 = vpop.eup %3113  ;;  %v890_v48 = vmul.f32 -0.5, %v4677_v11  ;;  %v865_v56 = vmul.f32 %v4499_v28, %v864_v8  ;;  %vm4711_vm9 = vcmp.lt.f32.partialorder %v866_v51, 0.0004427343  ;;  %v875_v0 = vand.u32 2147483647, %v4549_v34 }
 0x1c1   :  { %v4702_v63 = vpop.eup %3115  ;;  %3131 = vlog2.f32 %v887_v37  ;;  %v4717_v44 = vmul.f32 %v4644_v29, %v2459_v4  ;;  %v882_v30 = vadd.f32 1.0, %v881_v1  ;;  %v884_v53 = vand.u32 2147483647, %v4588_v49 }
 0x1c2   :  { %v3118_v40 = vpop.eup %3117  ;;  %3133 = vlog2.f32 %v2491_v15  ;;  %v4720_v33 = vadd.f32 1.0, %v2494_v6  ;;  %v896_v8 = vadd.f32 1.0, %v4702_v63  ;;  %v874_v37 = vmul.f32 %v4549_v34, %v873_v38 }
 0x1c3   :  { %v3120_v45 = vpop.eup %3119  ;;  %v853_v12 = vmul.f32 0.6931472, %v3118_v40  ;;  %v891_v21 = vadd.f32 1.0, %v890_v48  ;;  %v893_v4 = vand.u32 2147483647, %v4677_v11  ;;  %v2454_v1 = vsel %vm4679_vm6, %v4653_v41, %v4695_v55 }
 0x1c4   :  { %v3122_v2 = vpop.eup %3121  ;;  %v862_v28 = vmul.f32 0.6931472, %v3120_v45  ;;  %vm4733_vm15 = vcmp.lt.f32.partialorder %v875_v0, 0.0004427343  ;;  %3135 = vlog2.f32 %v896_v8  ;;  %v883_v15 = vmul.f32 %v4588_v49, %v882_v30 }
 0x1c5   :  { %v3124_v51 = vpop.eup %3123  ;;  %v859_v54 = vsel %vm4705_vm7, %v856_v43, %v853_v12  ;;  %vm4742_vm0 = vcmp.lt.f32.partialorder %v884_v53, 0.0004427343  ;;  %v899_v48 = vmul.f32 -0.5, %v4702_v63  ;;  %v5429_v0 = vand.u32 2147483647, %v4619_v18  ;;  %v2148_v53 = vpop.xlane.xlu0 %2147 }
 0x1c6   :  { %v3126_v40 = vpop.eup %3125  ;;  %v868_v45 = vsel %vm4711_vm9, %v865_v56, %v862_v28  ;;  %v979_v12 = vadd.f32 %v859_v54, %v4394_v60  ;;  %v1014_v49 = vrot.slane %v4473_v46, %v3224_v7  ;;  %v1018_v30 = vrot.slane %v4572_v57, %v3224_v7 }
 0x1c7   :  { %v4739_v34 = vpop.eup %3127  ;;  %v871_v38 = vmul.f32 0.6931472, %v3126_v40  ;;  %vm4749_vm1 = vcmp.lt.f32.partialorder %v5429_v0, 0.0004427343  ;;  %v980_v28 = vadd.f32 %v868_v45, %v4411_v17  ;;  %v892_v18 = vmul.f32 %v4677_v11, %v891_v21 }
 0x1c8   :  { %v3130_v59 = vpop.eup %3129  ;;  %vm4762_vm4 = vcmp.lt.f32.partialorder %v893_v4, 0.0004427343  ;;  %v900_v60 = vadd.f32 1.0, %v899_v48  ;;  %v1022_v54 = vrot.slane %v979_v12, %v3224_v7  ;;  %v5434_v57 = vand.u32 2147483647, %v4629_v62 }
 0x1c9   :  { %v877_v8 = vsel %vm4733_vm15, %v874_v37, %v871_v38  ;;  %v880_v40 = vmul.f32 0.6931472, %v3130_v59  ;;  %v1026_v46 = vrot.slane %v980_v28, %v3224_v7  ;;  %v902_v11 = vand.u32 2147483647, %v4702_v63  ;;  %v4786_v59 = vpop.xlane.xlu1 %2171 }
 0x1ca   :  { %v981_v17 = vadd.f32 %v877_v8, %v4617_v26  ;;  %vm4771_vm5 = vcmp.lt.f32.partialorder %v5434_v57, 0.0004427343  ;;  %v1076_v37 = vsel %vm1075_vm2, %v1018_v30, %v1014_v49  ;;  %v4779_v4 = vmul.f32 0.33333334, %v2160_v13 }
 0x1cb   :  { %v886_v21 = vsel %vm4742_vm0, %v883_v15, %v880_v40  ;;  %v3132_v26 = vpop.eup %3131  ;;  %v1078_v62 = vsel %vm1077_vm3, %v1022_v54, %v1076_v37  ;;  %v4784_v48 = vmul.f32 0.33333334, %v2148_v53  ;;  %v2430_v12 = vmul.f32 0.6931472, %v3122_v2  ;;  %v4794_v40 = vpop.xlane.xlu0 %2138 }
 0x1cc   :  { %v982_v6 = vadd.f32 %v886_v21, %v4624_v20  ;;  %v1030_v38 = vrot.slane %v981_v17, %v3224_v7  ;;  %v889_v43 = vmul.f32 0.6931472, %v3132_v26  ;;  %v1080_v15 = vsel %vm1079_vm8, %v1026_v46, %v1078_v62  ;;  %v3134_v49 = vpop.eup %3133 }
 0x1cd   :  { %v2356_v28 = vand.u32 2147483647, %v4779_v4  ;;  %v901_v13 = vmul.f32 %v4702_v63, %v900_v60  ;;  %v2352_v8 = vand.u32 2147483647, %v4784_v48  ;;  %v5437_v53 = vand.u32 2147483647, %v4599_v50 }
 0x1ce   :  { %v1034_v30 = vrot.slane %v982_v6, %v3224_v7  ;;  %v1082_v20 = vsel %vm1081_vm10, %v1030_v38, %v1080_v15  ;;  %v895_v17 = vsel %vm4762_vm4, %v892_v18, %v889_v43  ;;  %v751_v63 = vsub.f32 0.0, %v4536_v3  ;;  %v3136_v46 = vpop.eup %3135  ;;  %v4825_v43 = vpop.xlane.xlu1 %2162 }
 0x1cf   :  { %vm4798_vm7 = vcmp.lt.f32.partialorder %v5437_v53, 0.0004427343  ;;  %v2372_v54 = vsub.f32 0.0, %v2356_v28  ;;  %v752_v60 = vsub.f32 0.0, %v4569_v32  ;;  %v2421_v57 = vmul.f32 0.6931472, %v3124_v51 }
 0x1d0   :  { %vm4806_vm9 = vcmp.lt.f32.partialorder %v902_v11, 0.0004427343  ;;  %v983_v50 = vadd.f32 %v895_v17, %v4634_v61  ;;  %v2368_v37 = vsub.f32 0.0, %v2352_v8  ;;  %v2520_v26 = vmul.f32 0.6931472, %v4693_v35 }
 0x1d1   :  { %v2436_v18 = vsel %vm4749_vm1, %v4684_v10, %v2430_v12  ;;  %v5442_v0 = vand.u32 2147483647, %v4644_v29  ;;  %v898_v51 = vmul.f32 0.6931472, %v3136_v46  ;;  %v2398_v11 = vmul.f32 1.442695, %v2372_v54 }
 0x1d2   :  { %v1038_v38 = vrot.slane %v983_v50, %v3224_v7  ;;  %v1084_v62 = vsel %vm1083_vm11, %v1034_v30, %v1082_v20  ;;  %v2390_v61 = vmul.f32 1.442695, %v2368_v37  ;;  %v783_v35 = vand.u32 2147483647, %v751_v63  ;;  %v4836_v30 = vpop.xlane.xlu0 %2150  ;;  %v4867_v41 = vpop.xlane.xlu1 %2174  ;;  %v5473_v46 = vld [vmem:[#allocation3_spill] sm:$0xff] }
 0x1d3   :  { %vm4817_vm15 = vcmp.lt.f32.partialorder %v5442_v0, 0.0004427343  ;;  %v904_v10 = vsel %vm4806_vm9, %v901_v13, %v898_v51  ;;  %3137 = vpow2.f32 %v2398_v11  ;;  %v784_v29 = vand.u32 2147483647, %v752_v60 }
 0x1d4   :  { %v923_v56 = vadd.f32 1.0, %v4470_v19  ;;  %v2427_v12 = vsel %vm4771_vm5, %v4698_v25, %v2421_v57  ;;  %v984_v15 = vadd.f32 %v904_v10, %v4636_v47  ;;  %3139 = vpow2.f32 %v2390_v61 }
 0x1d5   :  { %v799_v28 = vsub.f32 0.0, %v783_v35  ;;  %v2457_v20 = vmul.f32 0.6931472, %v4739_v34  ;;  %v1086_v13 = vsel %vm1085_vm12, %v1038_v38, %v1084_v62  ;;  %v800_v8 = vsub.f32 0.0, %v784_v29 }
 0x1d6   :  { %3141 = vlog2.f32 %v923_v56  ;;  %v1042_v53 = vrot.slane %v984_v15, %v3224_v7  ;;  %v926_v54 = vmul.f32 -0.5, %v4470_v19  ;;  %v932_v45 = vadd.f32 1.0, %v4530_v31  ;;  %v4897_v61 = vpop.xlane.xlu1 %1815 }
 0x1d7   :  { %v829_v17 = vmul.f32 1.442695, %v799_v28  ;;  %v5445_v25 = vmax.f32 %v4466_v5, 0.0  ;;  %v5446_v34 = vand.u32 2147483647, %v4667_v22  ;;  %v941_v21 = vadd.f32 1.0, %v4565_v52 }
 0x1d8   :  { %v831_v57 = vmul.f32 1.442695, %v800_v8  ;;  %v2526_v5 = vsel %vm4798_vm7, %v4675_v16, %v2520_v26  ;;  %v5449_v23 = vmax.f32 %v4482_v9, 0.0  ;;  %v1088_v55 = vsel %vm1087_vm13, %v1042_v53, %v1086_v13  ;;  %v4880_v26 = vpop.xlane.xlu0 %1779 }
 0x1d9   :  { %v4850_v47 = vadd.f32 %v2454_v1, %v5445_v25  ;;  %vm4854_vm0 = vcmp.lt.f32.partialorder %v5446_v34, 0.0004427343  ;;  %3143 = vpow2.f32 %v829_v17  ;;  %v5450_v1 = vmax.f32 %v4497_v58, 0.0 }
 0x1da   :  { %v4864_v50 = vadd.f32 %v2436_v18, %v5449_v23  ;;  %v1099_v0 = vsel %vm1098_vm14, %v1088_v55, 0.0  ;;  %3145 = vpow2.f32 %v831_v57  ;;  %v935_v51 = vmul.f32 -0.5, %v4530_v31 }
 0x1db   :  { %v4871_v37 = vadd.f32 %v2427_v12, %v5450_v1  ;;  %v2463_v9 = vsel %vm4817_vm15, %v4717_v44, %v2457_v20  ;;  %v4878_v16 = vmul.f32 0.6931472, %v3134_v49  ;;  %1100 = vadd.xlane.f32.xlu0 %v1099_v0  ;;  %v927_v2 = vadd.f32 1.0, %v926_v54  ;;  %v5459_v0 = vld [vmem:[#allocation2_spill] sm:$0xff] }
 0x1dc   :  { %3147 = vlog2.f32 %v932_v45  ;;  %v4884_v58 = vmul.f32 %v4667_v22, %v4720_v33  ;;  %v929_v18 = vand.u32 2147483647, %v4470_v19  ;;  %v950_v11 = vadd.f32 1.0, %v4612_v36  ;;  %v4929_v57 = vpop.xlane.xlu0 %1803 }
 0x1dd   :  { %3149 = vlog2.f32 %v941_v21  ;;  %v2605_v6 = vrot.slane %v4850_v47, %v3224_v7  ;;  %v5451_v44 = vmax.f32 %v4468_v27, 0.0  ;;  %v2597_v38 = vrot.slane %v4864_v50, %v3224_v7  ;;  %v4899_v33 = vpop.eup %3137 }
 0x1de   :  { %v944_v62 = vmul.f32 -0.5, %v4565_v52  ;;  %v2593_v22 = vrot.slane %v4871_v37, %v3224_v7  ;;  %v5452_v35 = vmax.f32 %v4528_v14, 0.0  ;;  %v936_v29 = vadd.f32 1.0, %v935_v51  ;;  %v4907_v27 = vpop.eup %3139 }
 0x1df   :  { %v4892_v49 = vadd.f32 %v2526_v5, %v5451_v44  ;;  %3151 = vlog2.f32 %v950_v11  ;;  %v2499_v56 = vsel %vm4854_vm0, %v4884_v58, %v4878_v16  ;;  %v928_v12 = vmul.f32 %v4470_v19, %v927_v2 }
 0x1e0   :  { %v4905_v10 = vadd.f32 %v2463_v9, %v5452_v35  ;;  %v938_v15 = vand.u32 2147483647, %v4530_v31  ;;  %v953_v28 = vmul.f32 -0.5, %v4612_v36  ;;  %v3142_v20 = vpop.eup %3141  ;;  %v2500_v14 = vadd.f32 1.0, %v4899_v33  ;;  %v5460_v9 = vld [vmem:[#allocation10_spill] sm:$0xff]  ;;  %v5461_v35 = vld [vmem:[#allocation16_spill] sm:$0xff] }
 0x1e1   :  { %v5453_v13 = vsub.f32 0.0, %v4383_v39  ;;  %vm4919_vm6 = vcmp.lt.f32.partialorder %v929_v18, 0.0004427343  ;;  %v4924_v17 = vmul.f32 0.33333334, %v4737_v24  ;;  %v2464_v54 = vadd.f32 1.0, %v4907_v27 }
 0x1e2   :  { %v5456_v19 = vsub.f32 0.0, %v4408_v42  ;;  %v925_v25 = vmul.f32 0.6931472, %v3142_v20  ;;  %v945_v34 = vadd.f32 1.0, %v944_v62  ;;  %v4933_v39 = vmax.f32 %v751_v63, 0.0  ;;  %v4946_v63 = vpop.xlane.xlu1 %1782 }
 0x1e3   :  { %v765_v8 = vmax.f32 %v5453_v13, 0.0  ;;  %v937_v21 = vmul.f32 %v4530_v31, %v936_v29  ;;  %v947_v5 = vand.u32 2147483647, %v4565_v52  ;;  %v956_v24 = vand.u32 2147483647, %v4612_v36  ;;  %v3144_v23 = vpop.eup %3143 }
 0x1e4   :  { %v766_v45 = vmax.f32 %v5456_v19, 0.0  ;;  %v931_v55 = vsel %vm4919_vm6, %v928_v12, %v925_v25  ;;  %vm4940_vm1 = vcmp.lt.f32.partialorder %v938_v15, 0.0004427343  ;;  %v954_v1 = vadd.f32 1.0, %v953_v28  ;;  %v3146_v51 = vpop.eup %3145 }
 0x1e5   :  { %v1046_v3 = vrot.slane %v5459_v0, %v3224_v7  ;;  %3153 = vlog2.f32 %v2500_v14  ;;  %v959_v31 = vadd.f32 1.0, %v3144_v23  ;;  %v1050_v2 = vrot.slane %v5460_v9, %v3224_v7  ;;  %v5466_v0 = vld [vmem:[#allocation8_spill] sm:$0xff] }
 0x1e6   :  { %v2359_v18 = vand.u32 2147483647, %v4924_v17  ;;  %v3148_v11 = vpop.eup %3147  ;;  %3155 = vlog2.f32 %v2464_v54  ;;  %v946_v44 = vmul.f32 %v4565_v52, %v945_v34  ;;  %v968_v62 = vadd.f32 1.0, %v3146_v51  ;;  %v4962_v52 = vpop.xlane.xlu0 %1791 }
 0x1e7   :  { %v987_v29 = vadd.f32 %v931_v55, %v5461_v35  ;;  %v3150_v12 = vpop.eup %3149  ;;  %v934_v15 = vmul.f32 0.6931472, %v3148_v11  ;;  %vm4953_vm4 = vcmp.lt.f32.partialorder %v947_v5, 0.0004427343  ;;  %vm4957_vm5 = vcmp.lt.f32.partialorder %v956_v24, 0.0004427343 }
 0x1e8   :  { %3157 = vlog2.f32 %v959_v31  ;;  %v943_v14 = vmul.f32 0.6931472, %v3150_v12  ;;  %v955_v13 = vmul.f32 %v4612_v36, %v954_v1  ;;  %v962_v53 = vmul.f32 -0.5, %v3144_v23  ;;  %v4971_v1 = vpop.xlane.xlu1 %1806 }
 0x1e9   :  { %3159 = vlog2.f32 %v968_v62  ;;  %v3152_v54 = vpop.eup %3151  ;;  %v940_v19 = vsel %vm4940_vm1, %v937_v21, %v934_v15  ;;  %v971_v25 = vmul.f32 -0.5, %v3146_v51  ;;  %v1054_v34 = vrot.slane %v987_v29, %v3224_v7 }
 0x1ea   :  { %v2375_v5 = vsub.f32 0.0, %v2359_v18  ;;  %v949_v24 = vsel %vm4953_vm4, %v946_v44, %v943_v14  ;;  %v952_v55 = vmul.f32 0.6931472, %v3152_v54  ;;  %v988_v31 = vadd.f32 %v940_v19, %v5466_v0  ;;  %v4990_v20 = vpop.xlane.xlu0 %1785 }
 0x1eb   :  { %v1089_v36 = vsel %vm1075_vm2, %v1050_v2, %v1046_v3  ;;  %v965_v9 = vand.u32 2147483647, %v3144_v23  ;;  %v974_v11 = vand.u32 2147483647, %v3146_v51  ;;  %v989_v62 = vadd.f32 %v949_v24, %v765_v8 }
 0x1ec   :  { %v4974_v42 = vmul.f32 0.33333334, %v4794_v40  ;;  %v958_v21 = vsel %vm4957_vm5, %v955_v13, %v952_v55  ;;  %v963_v18 = vadd.f32 1.0, %v962_v53  ;;  %v1058_v35 = vrot.slane %v988_v31, %v3224_v7 }
 0x1ed   :  { %v4980_v44 = vmul.f32 0.33333334, %v4786_v59  ;;  %v972_v29 = vadd.f32 1.0, %v971_v25  ;;  %v1090_v3 = vsel %vm1077_vm3, %v1054_v34, %v1089_v36  ;;  %v2404_v2 = vmul.f32 1.442695, %v2375_v5  ;;  %v5001_v25 = vpop.xlane.xlu1 %1809 }
 0x1ee   :  { %v4984_v12 = vmul.f32 0.33333334, %v4836_v30  ;;  %v2503_v8 = vmul.f32 -0.5, %v4899_v33  ;;  %v768_v40 = vmax.f32 %v752_v60, 0.0  ;;  %v990_v15 = vadd.f32 %v958_v21, %v766_v45 }
 0x1ef   :  { %v2349_v28 = vand.u32 2147483647, %v4974_v42  ;;  %v3154_v14 = vpop.eup %3153  ;;  %v2467_v59 = vmul.f32 -0.5, %v4907_v27  ;;  %v2470_v13 = vand.u32 2147483647, %v4907_v27  ;;  %v1062_v30 = vrot.slane %v989_v62, %v3224_v7 }
 0x1f0   :  { %vm4994_vm7 = vcmp.lt.f32.partialorder %v965_v9, 0.0004427343  ;;  %v3156_v54 = vpop.eup %3155  ;;  %v964_v19 = vmul.f32 %v3144_v23, %v963_v18  ;;  %v1091_v32 = vsel %vm1079_vm8, %v1058_v35, %v1090_v3  ;;  %v2360_v45 = vand.u32 2147483647, %v4980_v44  ;;  %v5015_v3 = vpop.xlane.xlu0 %1794 }
 0x1f1   :  { %v2365_v60 = vsub.f32 0.0, %v2349_v28  ;;  %v973_v5 = vmul.f32 %v3146_v51, %v972_v29  ;;  %vm5003_vm9 = vcmp.lt.f32.partialorder %v974_v11, 0.0004427343  ;;  %3161 = vpow2.f32 %v2404_v2 }
 0x1f2   :  { %v3158_v34 = vpop.eup %3157  ;;  %v2353_v55 = vand.u32 2147483647, %v4984_v12  ;;  %v1066_v23 = vrot.slane %v990_v15, %v3224_v7  ;;  %v2376_v9 = vsub.f32 0.0, %v2360_v45  ;;  %v1092_v21 = vsel %vm1081_vm10, %v1062_v30, %v1091_v32  ;;  %v5471_v45 = vld [vmem:[#allocation9_spill] sm:$0xff] }
 0x1f3   :  { %v3160_v0 = vpop.eup %3159  ;;  %v961_v31 = vmul.f32 0.6931472, %v3158_v34  ;;  %v2384_v36 = vmul.f32 1.442695, %v2365_v60  ;;  %v5011_v35 = vmul.f32 0.33333334, %v4825_v43 }
 0x1f4   :  { %v970_v62 = vmul.f32 0.6931472, %v3160_v0  ;;  %v2369_v18 = vsub.f32 0.0, %v2353_v55  ;;  %v2468_v51 = vadd.f32 1.0, %v2467_v59  ;;  %v2406_v29 = vmul.f32 1.442695, %v2376_v9  ;;  %v5022_v59 = vpop.xlane.xlu1 %1818  ;;  %v5040_v24 = vpop.xlane.xlu0 %1797 }
 0x1f5   :  { %v967_v11 = vsel %vm4994_vm7, %v964_v19, %v961_v31  ;;  %3163 = vpow2.f32 %v2384_v36  ;;  %v2504_v2 = vadd.f32 1.0, %v2503_v8  ;;  %v1093_v32 = vsel %vm1083_vm11, %v1066_v23, %v1092_v21 }
 0x1f6   :  { %v976_v15 = vsel %vm5003_vm9, %v973_v5, %v970_v62  ;;  %v991_v28 = vadd.f32 %v967_v11, %v4933_v39  ;;  %v2392_v60 = vmul.f32 1.442695, %v2369_v18  ;;  %3165 = vpow2.f32 %v2406_v29 }
 0x1f7   :  { %v992_v30 = vadd.f32 %v976_v15, %v768_v40  ;;  %v2357_v43 = vand.u32 2147483647, %v5011_v35  ;;  %v2466_v53 = vmul.f32 0.6931472, %v3156_v54  ;;  %v5026_v8 = vmul.f32 0.33333334, %v4867_v41 }
 0x1f8   :  { %v1070_v19 = vrot.slane %v991_v28, %v3224_v7  ;;  %3167 = vpow2.f32 %v2392_v60  ;;  %v5472_v34 = vmax.f32 %v5471_v45, 0.0  ;;  %v2506_v40 = vand.u32 2147483647, %v4899_v33  ;;  %v5073_v18 = vpop.xlane.xlu1 %1821 }
 0x1f9   :  { %v2469_v5 = vmul.f32 %v4907_v27, %v2468_v51  ;;  %v1074_v54 = vrot.slane %v992_v30, %v3224_v7  ;;  %v2502_v55 = vmul.f32 0.6931472, %v3154_v14  ;;  %v2373_v0 = vsub.f32 0.0, %v2357_v43  ;;  %v1789_v30 = vpop.xlane.xlu0 %1788 }
 0x1fa   :  { %v5035_v39 = vadd.f32 %v2499_v56, %v5472_v34  ;;  %v1094_v41 = vsel %vm1085_vm12, %v1070_v19, %v1093_v32  ;;  %v2361_v31 = vand.u32 2147483647, %v5026_v8  ;;  %v5474_v23 = vrot.slane %v5473_v46, %v3224_v7 }
 0x1fb   :  { %v2505_v58 = vmul.f32 %v4899_v33, %v2504_v2  ;;  %vm5054_vm15 = vcmp.lt.f32.partialorder %v2470_v13, 0.0004427343  ;;  %v1095_v56 = vsel %vm1087_vm13, %v1074_v54, %v1094_v41  ;;  %v5059_v14 = vpop.eup %3161  ;;  %v2400_v62 = vmul.f32 1.442695, %v2373_v0 }
 0x1fc   :  { %v5051_v16 = vsel %vm1075_vm2, %v2593_v22, %v5474_v23  ;;  %v2472_v36 = vsel %vm5054_vm15, %v2469_v5, %v2466_v53  ;;  %v1102_v9 = vsel %vm1098_vm14, %v1095_v56, 0.0  ;;  %v2377_v37 = vsub.f32 0.0, %v2361_v31  ;;  %v1813_v46 = vpop.xlane.xlu1 %1812 }
 0x1fd   :  { %v2609_v22 = vrot.slane %v4905_v10, %v3224_v7  ;;  %v2625_v33 = vrot.slane %v5035_v39, %v3224_v7  ;;  %vm5068_vm0 = vcmp.lt.f32.partialorder %v2506_v40, 0.0004427343  ;;  %v2336_v21 = vmax.f32 %v4784_v48, 0.0  ;;  %1103 = vadd.xlane.f32.xlu1 %v1102_v9 }
 0x1fe   :  { %v2508_v51 = vsel %vm5068_vm0, %v2505_v58, %v2502_v55  ;;  %3169 = vpow2.f32 %v2400_v62  ;;  %v2408_v11 = vmul.f32 1.442695, %v2377_v37  ;;  %v1849_v29 = vrot.slane %v4946_v63, %v3224_v7 }
 0x1ff   :  { %v5079_v2 = vpop.eup %3163  ;;  %v2340_v15 = vmax.f32 %v4779_v4, 0.0  ;;  %v5082_v28 = vadd.f32 %v2472_v36, %v2336_v21  ;;  %v2343_v60 = vmax.f32 %v4924_v17, 0.0  ;;  %v2333_v48 = vmax.f32 %v4974_v42, 0.0 }
 0x200   :  { %v2527_v32 = vadd.f32 1.0, %v5059_v14  ;;  %v2437_v43 = vadd.f32 1.0, %v5079_v2  ;;  %v1845_v53 = vrot.slane %v4880_v26, %v3224_v7  ;;  %3171 = vpow2.f32 %v2408_v11  ;;  %v5090_v63 = vpop.eup %3165 }
 0x201   :  { %v5092_v19 = vadd.f32 %v2508_v51, %v2340_v15  ;;  %v2530_v4 = vmul.f32 -0.5, %v5059_v14  ;;  %v2344_v45 = vmax.f32 %v4980_v44, 0.0  ;;  %v2337_v34 = vmax.f32 %v4984_v12, 0.0 }
 0x202   :  { %v5097_v40 = vpop.eup %3167  ;;  %3173 = vlog2.f32 %v2437_v43  ;;  %v2536_v5 = vadd.f32 1.0, %v5090_v63  ;;  %v1906_v54 = vsel %vm1075_vm2, %v1849_v29, %v1845_v53  ;;  %v1857_v26 = vrot.slane %v1789_v30, %v3224_v7 }
 0x203   :  { %v2613_v55 = vrot.slane %v5082_v28, %v3224_v7  ;;  %v2440_v41 = vmul.f32 -0.5, %v5079_v2  ;;  %v2473_v0 = vadd.f32 1.0, %v5097_v40  ;;  %v1853_v31 = vrot.slane %v4990_v20, %v3224_v7 }
 0x204   :  { %3175 = vlog2.f32 %v2527_v32  ;;  %v2533_v23 = vand.u32 2147483647, %v5059_v14  ;;  %v1877_v58 = vrot.slane %v4929_v57, %v3224_v7  ;;  %v1881_v27 = vrot.slane %v4971_v1, %v3224_v7  ;;  %v1801_v57 = vpop.xlane.xlu0 %1800 }
 0x205   :  { %3177 = vlog2.f32 %v2473_v0  ;;  %v1861_v56 = vrot.slane %v4962_v52, %v3224_v7  ;;  %v1885_v36 = vrot.slane %v5001_v25, %v3224_v7  ;;  %v1907_v9 = vsel %vm1077_vm3, %v1853_v31, %v1906_v54 }
 0x206   :  { %v2531_v20 = vadd.f32 1.0, %v2530_v4  ;;  %3179 = vlog2.f32 %v2536_v5  ;;  %v1865_v62 = vrot.slane %v5015_v3, %v3224_v7  ;;  %v1908_v37 = vsel %vm1079_vm8, %v1857_v26, %v1907_v9  ;;  %v1825_v43 = vpop.xlane.xlu1 %1824 }
 0x207   :  { %v2441_v13 = vadd.f32 1.0, %v2440_v41  ;;  %v1893_v1 = vrot.slane %v4897_v61, %v3224_v7  ;;  %v1909_v21 = vsel %vm1081_vm10, %v1861_v56, %v1908_v37  ;;  %v1889_v52 = vrot.slane %v1813_v46, %v3224_v7 }
 0x208   :  { %v5125_v51 = vpop.eup %3169  ;;  %v2476_v25 = vmul.f32 -0.5, %v5097_v40  ;;  %v1913_v11 = vsel %vm1075_vm2, %v1881_v27, %v1877_v58  ;;  %v1869_v3 = vrot.slane %v5040_v24, %v3224_v7  ;;  %v1910_v29 = vsel %vm1083_vm11, %v1865_v62, %v1909_v21 }
 0x209   :  { %v2509_v15 = vadd.f32 1.0, %v5125_v51  ;;  %v1914_v30 = vsel %vm1077_vm3, %v1885_v36, %v1913_v11  ;;  %v1897_v61 = vrot.slane %v5022_v59, %v3224_v7  ;;  %v1873_v32 = vrot.slane %v1801_v57, %v3224_v7 }
 0x20a   :  { %v5137_v53 = vpop.eup %3171  ;;  %v2443_v4 = vand.u32 2147483647, %v5079_v2  ;;  %v1901_v5 = vrot.slane %v5073_v18, %v3224_v7  ;;  %v1915_v24 = vsel %vm1079_vm8, %v1889_v52, %v1914_v30  ;;  %v1911_v54 = vsel %vm1085_vm12, %v1869_v3, %v1910_v29 }
 0x20b   :  { %v2442_v26 = vmul.f32 %v5079_v2, %v2441_v13  ;;  %v2539_v41 = vmul.f32 -0.5, %v5090_v63  ;;  %3181 = vlog2.f32 %v2509_v15  ;;  %vm1922_vm14 = vcmask 15360  }
 0x20c   :  { %v3174_v59 = vpop.eup %3173  ;;  %v2477_v0 = vadd.f32 1.0, %v2476_v25  ;;  %v2545_v31 = vadd.f32 1.0, %v5137_v53  ;;  %v1916_v46 = vsel %vm1081_vm10, %v1893_v1, %v1915_v24  ;;  %v1905_v58 = vrot.slane %v1825_v43, %v3224_v7 }
 0x20d   :  { %v2439_v27 = vmul.f32 0.6931472, %v3174_v59  ;;  %v2479_v18 = vand.u32 2147483647, %v5097_v40  ;;  %v1912_v56 = vsel %vm1087_vm13, %v1873_v32, %v1911_v54  ;;  %v1917_v36 = vsel %vm1083_vm11, %v1897_v61, %v1916_v46 }
 0x20e   :  { %v3176_v2 = vpop.eup %3175  ;;  %vm2444_vm6 = vcmp.lt.f32.partialorder %v2443_v4, 0.0004427343  ;;  %v2512_v9 = vmul.f32 -0.5, %v5125_v51  ;;  %3183 = vlog2.f32 %v2545_v31  ;;  %v1923_v62 = vsel %vm1922_vm14, %v1912_v56, 0.0 }
 0x20f   :  { %v3178_v37 = vpop.eup %3177  ;;  %v2445_v57 = vsel %vm2444_vm6, %v2442_v26, %v2439_v27  ;;  %v2540_v13 = vadd.f32 1.0, %v2539_v41  ;;  %v2542_v1 = vand.u32 2147483647, %v5090_v63  ;;  %1924 = vadd.xlane.f32.xlu0 %v1923_v62  ;;  %v1918_v21 = vsel %vm1085_vm12, %v1901_v5, %v1917_v36 }
 0x210   :  { %v3180_v52 = vpop.eup %3179  ;;  %v2557_v25 = vadd.f32 %v2445_v57, %v2333_v48  ;;  %v2475_v11 = vmul.f32 0.6931472, %v3178_v37  ;;  %v2478_v3 = vmul.f32 %v5097_v40, %v2477_v0  ;;  %v1919_v29 = vsel %vm1087_vm13, %v1905_v58, %v1918_v21 }
 0x211   :  { %v2529_v15 = vmul.f32 0.6931472, %v3176_v2  ;;  %vm2480_vm1 = vcmp.lt.f32.partialorder %v2479_v18, 0.0004427343  ;;  %v2548_v30 = vmul.f32 -0.5, %v5137_v53  ;;  %v1926_v61 = vsel %vm1922_vm14, %v1919_v29, 0.0 }
 0x212   :  { %v2532_v32 = vmul.f32 %v5059_v14, %v2531_v20  ;;  %v2601_v43 = vrot.slane %v2557_v25, %v3224_v7  ;;  %v2481_v4 = vsel %vm2480_vm1, %v2478_v3, %v2475_v11  ;;  %v2513_v5 = vadd.f32 1.0, %v2512_v9  ;;  %1927 = vadd.xlane.f32.xlu1 %v1926_v61 }
 0x213   :  { %v2538_v42 = vmul.f32 0.6931472, %v3180_v52  ;;  %v2561_v48 = vadd.f32 %v2481_v4, %v2337_v34  ;;  %v2515_v40 = vand.u32 2147483647, %v5125_v51  ;;  %v2651_v24 = vsel %vm1077_vm3, %v2597_v38, %v5051_v16 }
 0x214   :  { %vm5174_vm4 = vcmp.lt.f32.partialorder %v2533_v23, 0.0004427343  ;;  %v2541_v54 = vmul.f32 %v5090_v63, %v2540_v13  ;;  %vm5179_vm5 = vcmp.lt.f32.partialorder %v2542_v1, 0.0004427343  ;;  %v2652_v12 = vsel %vm1079_vm8, %v2601_v43, %v2651_v24 }
 0x215   :  { %v3182_v34 = vpop.eup %3181  ;;  %v2535_v50 = vsel %vm5174_vm4, %v2532_v32, %v2529_v15  ;;  %v2549_v41 = vadd.f32 1.0, %v2548_v30  ;;  %v2617_v38 = vrot.slane %v2561_v48, %v3224_v7  ;;  %v2653_v16 = vsel %vm1081_vm10, %v2605_v6, %v2652_v12 }
 0x216   :  { %v2511_v14 = vmul.f32 0.6931472, %v3182_v34  ;;  %v2514_v63 = vmul.f32 %v5125_v51, %v2513_v5  ;;  %v2551_v23 = vand.u32 2147483647, %v5137_v53  ;;  %v2654_v59 = vsel %vm1083_vm11, %v2609_v22, %v2653_v16 }
 0x217   :  { %v2544_v0 = vsel %vm5179_vm5, %v2541_v54, %v2538_v42  ;;  %v2341_v31 = vmax.f32 %v5011_v35, 0.0  ;;  %vm2516_vm7 = vcmp.lt.f32.partialorder %v2515_v40, 0.0004427343  ;;  %v2655_v47 = vsel %vm1085_vm12, %v2613_v55, %v2654_v59 }
 0x218   :  { %v3184_v6 = vpop.eup %3183  ;;  %v2629_v51 = vrot.slane %v5092_v19, %v3224_v7  ;;  %v2567_v10 = vadd.f32 %v2535_v50, %v2343_v60  ;;  %v2517_v46 = vsel %vm2516_vm7, %v2514_v63, %v2511_v14  ;;  %v2656_v22 = vsel %vm1087_vm13, %v2617_v38, %v2655_v47  ;;  %v5483_v19 = vld [vmem:[#allocation11_spill] sm:$0xff] }
 0x219   :  { %v2565_v58 = vadd.f32 %v2517_v46, %v2341_v31  ;;  %v2547_v27 = vmul.f32 0.6931472, %v3184_v6  ;;  %v2550_v35 = vmul.f32 %v5137_v53, %v2549_v41  ;;  %v2666_v18 = vsel %vm1922_vm14, %v2656_v22, 0.0 }
 0x21a   :  { %v2568_v28 = vadd.f32 %v2544_v0, %v2344_v45  ;;  %v2345_v55 = vmax.f32 %v5026_v8, 0.0  ;;  %vm2552_vm9 = vcmp.lt.f32.partialorder %v2551_v23, 0.0004427343  ;;  %2667 = vadd.xlane.f32.xlu0 %v2666_v18  ;;  %v5484_v17 = vrot.slane %v5483_v19, %v3224_v7 }
 0x21b   :  { %v2633_v56 = vrot.slane %v2565_v58, %v3224_v7  ;;  %v2553_v53 = vsel %vm2552_vm9, %v2550_v35, %v2547_v27  ;;  %v2637_v36 = vrot.slane %v4892_v49, %v3224_v7  ;;  %v2641_v8 = vrot.slane %v2567_v10, %v3224_v7 }
 0x21c   :  { %v2657_v60 = vsel %vm1075_vm2, %v2625_v33, %v5484_v17  ;;  %v2569_v45 = vadd.f32 %v2553_v53, %v2345_v55  ;;  %v2645_v9 = vrot.slane %v2568_v28, %v3224_v7  ;;  %vm1933_vm2 = vcmask 7168  }
 0x21d   :  { %v2658_v44 = vsel %vm1077_vm3, %v2629_v51, %v2657_v60 }
 0x21e   :  { %v2659_v2 = vsel %vm1079_vm8, %v2633_v56, %v2658_v44  ;;  %v2649_v62 = vrot.slane %v2569_v45, %v3224_v7 }
 0x21f   :  { %v2660_v39 = vsel %vm1081_vm10, %v2637_v36, %v2659_v2 }
 0x220   :  { %v2661_v33 = vsel %vm1083_vm11, %v2641_v8, %v2660_v39 }
 0x221   :  { %v2662_v37 = vsel %vm1085_vm12, %v2645_v9, %v2661_v33 }
 0x222   :  { %v2663_v57 = vsel %vm1087_vm13, %v2649_v62, %v2662_v37 }
 0x223   :  { %v2669_v49 = vsel %vm1922_vm14, %v2663_v57, 0.0 }
 0x224   :  { %2670 = vadd.xlane.f32.xlu1 %v2669_v49 }
 0x22c   :  { %v2291_v13 = vpop.xlane.xlu0 %2290 }
 0x22d   :  { %v2296_v1 = vmul.f32 0.25, %v2291_v13 }
 0x22f   :  { %v2298_v21 = vsub.f32 0.0, %v2296_v1 }
 0x231   :  { %v2302_v25 = vand.u32 2147483647, %v2298_v21  ;;  %v2300_v14 = vmax.f32 %v2298_v21, 0.0 }
 0x233   :  { %v2304_v3 = vsub.f32 0.0, %v2302_v25 }
 0x235   :  { %v2306_v7 = vmul.f32 1.442695, %v2304_v3 }
 0x237   :  { %3185 = vpow2.f32 %v2306_v7 }
 0x23c   :  { %v2294_v52 = vpop.xlane.xlu1 %2293 }
 0x23d   :  { %v2297_v11 = vmul.f32 0.25, %v2294_v52 }
 0x23f   :  { %v2299_v29 = vsub.f32 0.0, %v2297_v11 }
 0x241   :  { %v2303_v15 = vand.u32 2147483647, %v2299_v29  ;;  %v3186_v32 = vpop.eup %3185  ;;  %v2301_v46 = vmax.f32 %v2299_v29, 0.0 }
 0x242   :  { %v2310_v43 = vadd.f32 1.0, %v3186_v32  ;;  %v2313_v5 = vmul.f32 -0.5, %v3186_v32  ;;  %v2316_v26 = vand.u32 2147483647, %v3186_v32 }
 0x243   :  { %v2305_v30 = vsub.f32 0.0, %v2303_v15 }
 0x244   :  { %v2314_v24 = vadd.f32 1.0, %v2313_v5  ;;  %vm2317_vm3 = vcmp.lt.f32.partialorder %v2316_v26, 0.0004427343 }
 0x245   :  { %v2308_v61 = vmul.f32 1.442695, %v2305_v30 }
 0x246   :  { %v2315_v50 = vmul.f32 %v3186_v32, %v2314_v24 }
 0x247   :  { %3187 = vpow2.f32 %v2308_v61 }
 0x248   :  { %3189 = vlog2.f32 %v2310_v43 }
 0x251   :  { %v3188_v4 = vpop.eup %3187 }
 0x252   :  { %v2319_v42 = vadd.f32 1.0, %v3188_v4  ;;  %v3190_v20 = vpop.eup %3189  ;;  %v2322_v16 = vmul.f32 -0.5, %v3188_v4  ;;  %v2325_v0 = vand.u32 2147483647, %v3188_v4 }
 0x253   :  { %v2312_v34 = vmul.f32 0.6931472, %v3190_v20 }
 0x254   :  { %3191 = vlog2.f32 %v2319_v42  ;;  %v2323_v23 = vadd.f32 1.0, %v2322_v16  ;;  %vm2326_vm8 = vcmp.lt.f32.partialorder %v2325_v0, 0.0004427343 }
 0x255   :  { %v2318_v63 = vsel %vm2317_vm3, %v2315_v50, %v2312_v34 }
 0x256   :  { %v2328_v31 = vadd.f32 %v2318_v63, %v2300_v14  ;;  %v2324_v10 = vmul.f32 %v3188_v4, %v2323_v23 }
 0x25e   :  { %v3192_v59 = vpop.eup %3191 }
 0x25f   :  { %v2321_v51 = vmul.f32 0.6931472, %v3192_v59 }
 0x261   :  { %v2327_v22 = vsel %vm2326_vm8, %v2324_v10, %v2321_v51 }
 0x262   :  { %v2329_v58 = vadd.f32 %v2327_v22, %v2301_v46 }
 0x268   :  { %v1101_v48 = vpop.xlane.xlu0 %1100 }
 0x28a   :  { %v1104_v40 = vpop.xlane.xlu1 %1103 }
 0x29c   :  { %v1925_v54 = vpop.xlane.xlu0 %1924 }
 0x29d   :  { %v1929_v12 = vadd.f32 %v1925_v54, %v1101_v48 }
 0x29f   :  { %1934 = vst.msk [vmem:[%s5253_s3] sm:$0xff] %vm1933_vm2, %v1929_v12  ;;  %v1928_v41 = vpop.xlane.xlu1 %1927 }
 0x2a0   :  { %v1930_v38 = vadd.f32 %v1928_v41, %v1104_v40 }
 0x2a2   :  { %1935 = vst.msk [vmem:[%s5253_s3 + $0x8] sm:$0xff] %vm1933_vm2, %v1930_v38 }
 0x2a7   :  { %v2668_v47 = vpop.xlane.xlu0 %2667 }
 0x2a8   :  { %v2672_v6 = vadd.f32 %v2668_v47, %v2328_v31 }
 0x2aa   :  { %2676 = vst.msk [vmem:[%s5254_s4] sm:$0xff] %vm1933_vm2, %v2672_v6 }
 0x2b1   :  { %v2671_v27 = vpop.xlane.xlu1 %2670 }
 0x2b2   :  { %v2673_v35 = vadd.f32 %v2671_v27, %v2329_v58 }
 0x2b4   :  { %2677 = vst.msk [vmem:[%s5254_s4 + $0x8] sm:$0xff] %vm1933_vm2, %v2673_v35 }

</bundles_post_ra>
